<compile_context>
chip_gen: v6e
topology: v6e:2x2x1
jax: 0.10.0
libtpu: 0.0.40
codegen_flags: <defaults>
</compile_context>

<pallas_src>
import math

import jax
import jax.numpy as jnp
from jax import lax
from jax.experimental import pallas as pl
from jax.experimental.pallas import tpu as pltpu

# ------------------------- small synthetic BERT config -------------------------
VOCAB = 100
SEQ = 8                    # SenLen
HIDDEN = 32                # dimC  (BERT hidden size)
HEADS = 2
HEAD_DIM = HIDDEN // HEADS
LAYERS = 2
INTERMEDIATE = 64
ENCODED_DIM = 2 * HIDDEN   # EncodedDim = 2 * dimC
LN_EPS = 1e-12
BATCH = 2


# ------------------------------- fused kernel ----------------------------------
def _layer_norm(x, g, b):
    mean = jnp.mean(x, axis=-1, keepdims=True)
    xc = x - mean
    var = jnp.mean(xc * xc, axis=-1, keepdims=True)
    return xc * lax.rsqrt(var + LN_EPS) * g + b


def _generator_kernel(x_ref, bias_ref, ml_ref, mr_ref,
                      embg_ref, embb_ref, cwl_ref, cwr_ref, cb_ref,
                      wqkv_ref, bqkv_ref, wo_ref, bo_ref,
                      ln1g_ref, ln1b_ref, w1_ref, b1_ref, w2_ref, b2_ref,
                      ln2g_ref, ln2b_ref,
                      logits_ref, h_scr):
    """grid=(LAYERS,).  h_scr (B*S, H) carries the hidden state across layers."""
    layer = pl.program_id(0)

    # Embedding LayerNorm folded into the first grid step.
    @pl.when(layer == 0)
    def _():
        h_scr[...] = _layer_norm(x_ref[...], embg_ref[...], embb_ref[...])

    h = h_scr[...]                                              # (B*S, H)

    # ---- fused Q|K|V projection: one matmul, lane-dense (B*S, 3H) output ----
    qkv = jnp.dot(h, wqkv_ref[0], preferred_element_type=jnp.float32) + bqkv_ref[0]
    q = qkv[:, 0 * HIDDEN:1 * HIDDEN]
    k = qkv[:, 1 * HIDDEN:2 * HIDDEN]
    v = qkv[:, 2 * HIDDEN:3 * HIDDEN]

    # ---- multi-head self-attention, all heads in this invocation ----
    scale = 1.0 / math.sqrt(HEAD_DIM)
    bias_all = bias_ref[...]                                    # (B, S)
    batch_ctx = []
    for b in range(BATCH):                                      # static unroll (B=2)
        r = slice(b * SEQ, (b + 1) * SEQ)
        bias_b = bias_all[b:b + 1, :]                           # (1, S)
        head_ctx = []
        for hh in range(HEADS):                                 # static unroll (HEADS=2)
            c = slice(hh * HEAD_DIM, (hh + 1) * HEAD_DIM)
            qh, kh, vh = q[r, c], k[r, c], v[r, c]              # (S, Dh)
            s = lax.dot_general(qh, kh, (((1,), (1,)), ((), ())),
                                preferred_element_type=jnp.float32)   # (S, S)
            s = s * scale + bias_b
            s = s - jnp.max(s, axis=-1, keepdims=True)
            p = jnp.exp(s)
            # softmax normalization on the EUP slot (free) instead of VPU division
            p = p * pl.reciprocal(jnp.sum(p, axis=-1, keepdims=True), approx=True)
            head_ctx.append(jnp.dot(p, vh, preferred_element_type=jnp.float32))
        batch_ctx.append(jnp.concatenate(head_ctx, axis=-1))    # (S, H)
    ctx = jnp.concatenate(batch_ctx, axis=0)                    # (B*S, H)

    # ---- output projection + residual + LN1 ----
    attn_out = jnp.dot(ctx, wo_ref[0], preferred_element_type=jnp.float32) + bo_ref[0]
    h = _layer_norm(h + attn_out, ln1g_ref[0], ln1b_ref[0])

    # ---- FFN + residual + LN2 ----
    ffn = jnp.dot(h, w1_ref[0], preferred_element_type=jnp.float32) + b1_ref[0]
    # TODO(synk): BERT's exact erf-GELU; tanh approximation used for robust Mosaic lowering.
    ffn = jax.nn.gelu(ffn, approximate=True)
    ffn = jnp.dot(ffn, w2_ref[0], preferred_element_type=jnp.float32) + b2_ref[0]
    h = _layer_norm(h + ffn, ln2g_ref[0], ln2b_ref[0])

    h_scr[...] = h                                              # carry to next layer

    # ---- DMBERT dynamic max pooling + classifier, fused at the last layer ----
    @pl.when(layer == pl.num_programs(0) - 1)
    def _():
        ml = ml_ref[...]                                        # (B*S, 1)
        mr = mr_ref[...]
        cwl = cwl_ref[...]                                      # (1, H)  c_w[:H]
        cwr = cwr_ref[...]                                      # (1, H)  c_w[H:]
        cb = cb_ref[...]                                        # (1, 1)
        rows = []
        for b in range(BATCH):
            r = slice(b * SEQ, (b + 1) * SEQ)
            hb = h[r, :]                                        # (S, H)
            pooled_l = jnp.max(hb * ml[r, :] + 1.0, axis=0, keepdims=True) - 1.0
            pooled_r = jnp.max(hb * mr[r, :] + 1.0, axis=0, keepdims=True) - 1.0
            logit = (jnp.sum(pooled_l * cwl, axis=-1, keepdims=True)
                     + jnp.sum(pooled_r * cwr, axis=-1, keepdims=True)
                     + cb)                                      # (1, 1)
            rows.append(logit)
        logits_ref[...] = jnp.concatenate(rows, axis=0)         # (B, 1)


# ------------------------------ parameters (synthetic) -------------------------
def init_params(key):
    keys = iter(jax.random.split(key, 64))

    def nrm(shape):
        return jax.random.normal(next(keys), shape, jnp.float32) * 0.02

    params = {
        "word_emb": nrm((VOCAB, HIDDEN)),
        "pos_emb": nrm((SEQ, HIDDEN)),
        "type_emb": nrm((2, HIDDEN)),
        "emb_ln_g": jnp.ones((1, HIDDEN), jnp.float32),
        "emb_ln_b": jnp.zeros((1, HIDDEN), jnp.float32),
        "c_w": nrm((ENCODED_DIM, 1)),            # self.C = nn.Linear(EncodedDim, 1)
        "c_b": jnp.zeros((1, 1), jnp.float32),
    }
    # Per-layer weights stacked along a leading LAYERS axis; Q|K|V fused.
    wq = nrm((LAYERS, HIDDEN, HIDDEN))
    wk = nrm((LAYERS, HIDDEN, HIDDEN))
    wv = nrm((LAYERS, HIDDEN, HIDDEN))
    params["wqkv"] = jnp.concatenate([wq, wk, wv], axis=-1)          # (L, H, 3H)
    params["bqkv"] = jnp.zeros((LAYERS, 1, 3 * HIDDEN), jnp.float32)
    params["wo"] = nrm((LAYERS, HIDDEN, HIDDEN))
    params["bo"] = jnp.zeros((LAYERS, 1, HIDDEN), jnp.float32)
    params["ln1_g"] = jnp.ones((LAYERS, 1, HIDDEN), jnp.float32)
    params["ln1_b"] = jnp.zeros((LAYERS, 1, HIDDEN), jnp.float32)
    params["w1"] = nrm((LAYERS, HIDDEN, INTERMEDIATE))
    params["b1"] = jnp.zeros((LAYERS, 1, INTERMEDIATE), jnp.float32)
    params["w2"] = nrm((LAYERS, INTERMEDIATE, HIDDEN))
    params["b2"] = jnp.zeros((LAYERS, 1, HIDDEN), jnp.float32)
    params["ln2_g"] = jnp.ones((LAYERS, 1, HIDDEN), jnp.float32)
    params["ln2_b"] = jnp.zeros((LAYERS, 1, HIDDEN), jnp.float32)
    return params


# ------------------------------- forward pass ----------------------------------
def generator_forward(params, inp, in_mask, maskL, maskR):
    B, S = inp.shape

    # BERT embedding lookups (gather = XLA glue); everything else is one kernel.
    h = (params["word_emb"][inp]
         + params["pos_emb"][jnp.arange(S)][None, :, :]
         + params["type_emb"][0][None, None, :])                # token_type_ids=None -> 0
    x = h.reshape(B * S, HIDDEN).astype(jnp.float32)

    # Extended attention mask: (1 - mask) * -10000, same for every head/query row.
    bias = (1.0 - in_mask.astype(jnp.float32)) * -10000.0       # (B, S)
    ml = maskL.astype(jnp.float32).reshape(B * S, 1)
    mr = maskR.astype(jnp.float32).reshape(B * S, 1)
    cwl = params["c_w"][:HIDDEN, :].reshape(1, HIDDEN)          # classifier, L half
    cwr = params["c_w"][HIDDEN:, :].reshape(1, HIDDEN)          # classifier, R half

    def const_spec(shape):
        return pl.BlockSpec(tuple(shape), lambda l: (0,) * len(shape))

    def layer_spec(full_shape):
        blk = (1,) + tuple(full_shape[1:])
        return pl.BlockSpec(blk, lambda l: (l,) + (0,) * (len(full_shape) - 1))

    in_arrays = [
        x, bias, ml, mr,
        params["emb_ln_g"], params["emb_ln_b"], cwl, cwr, params["c_b"],
        params["wqkv"], params["bqkv"], params["wo"], params["bo"],
        params["ln1_g"], params["ln1_b"], params["w1"], params["b1"],
        params["w2"], params["b2"], params["ln2_g"], params["ln2_b"],
    ]
    in_specs = ([const_spec(a.shape) for a in in_arrays[:9]]
                + [layer_spec(a.shape) for a in in_arrays[9:]])

    logits = pl.pallas_call(
        _generator_kernel,
        out_shape=jax.ShapeDtypeStruct((B, 1), jnp.float32),
        grid_spec=pltpu.PrefetchScalarGridSpec(
            num_scalar_prefetch=0,
            grid=(LAYERS,),
            in_specs=in_specs,
            out_specs=const_spec((B, 1)),
            scratch_shapes=[pltpu.VMEM((B * S, HIDDEN), jnp.float32)],
        ),
        compiler_params=pltpu.CompilerParams(
            dimension_semantics=("arbitrary",)),   # layers are sequential; no megacore split
    )(*in_arrays)

    # NOTE: nn.Dropout is defined but unused in DMBERT_Encoder.forward (eval identity).
    return logits.reshape(B)                                    # self.C(reps).view(B)


# ---------------------------------- main ----------------------------------------
if __name__ == "__main__":
    key = jax.random.PRNGKey(0)
    pkey, ikey = jax.random.split(key)
    params = init_params(pkey)

    inp = jax.random.randint(ikey, (BATCH, SEQ), 0, VOCAB, dtype=jnp.int32)
    in_mask = jnp.ones((BATCH, SEQ), jnp.float32)
    anchors = jnp.array([3, 5])
    pos = jnp.arange(SEQ)[None, :]
    maskL = (pos <= anchors[:, None]).astype(jnp.float32)
    maskR = (pos >= anchors[:, None]).astype(jnp.float32)

    out = jax.jit(generator_forward)(params, inp, in_mask, maskL, maskR)
    out = jax.block_until_ready(out)
    assert out.shape == (BATCH,) and out.dtype == jnp.float32
    print("KERNEL_OK")
</pallas_src>

<mosaic_0001>
module attributes {stable_mosaic.version = 11 : i64} {
  func.func @_generator_kernel(%arg0: i32, %arg1: memref<16x32xf32, #tpu.memory_space<vmem>>, %arg2: memref<2x8xf32, #tpu.memory_space<vmem>>, %arg3: memref<16x1xf32, #tpu.memory_space<vmem>>, %arg4: memref<16x1xf32, #tpu.memory_space<vmem>>, %arg5: memref<1x32xf32, #tpu.memory_space<vmem>>, %arg6: memref<1x32xf32, #tpu.memory_space<vmem>>, %arg7: memref<1x32xf32, #tpu.memory_space<vmem>>, %arg8: memref<1x32xf32, #tpu.memory_space<vmem>>, %arg9: memref<1x1xf32, #tpu.memory_space<vmem>>, %arg10: memref<1x32x96xf32, #tpu.memory_space<vmem>>, %arg11: memref<1x1x96xf32, #tpu.memory_space<vmem>>, %arg12: memref<1x32x32xf32, #tpu.memory_space<vmem>>, %arg13: memref<1x1x32xf32, #tpu.memory_space<vmem>>, %arg14: memref<1x1x32xf32, #tpu.memory_space<vmem>>, %arg15: memref<1x1x32xf32, #tpu.memory_space<vmem>>, %arg16: memref<1x32x64xf32, #tpu.memory_space<vmem>>, %arg17: memref<1x1x64xf32, #tpu.memory_space<vmem>>, %arg18: memref<1x64x32xf32, #tpu.memory_space<vmem>>, %arg19: memref<1x1x32xf32, #tpu.memory_space<vmem>>, %arg20: memref<1x1x32xf32, #tpu.memory_space<vmem>>, %arg21: memref<1x1x32xf32, #tpu.memory_space<vmem>>, %arg22: memref<2x1xf32, #tpu.memory_space<vmem>>, %arg23: memref<16x32xf32, #tpu.memory_space<vmem>>) attributes {dimension_semantics = [#tpu.dimension_semantics<arbitrary>], iteration_bounds = array<i64: 2>, scalar_prefetch = 0 : i64, scratch_operands = 1 : i64, tpu.core_type = #tpu.core_type<tc>, window_params = [{pipeline_mode = #tpu.pipeline_mode<synchronous>, transform_indices = @transform_0, window_bounds = array<i64: 16, 32>}, {pipeline_mode = #tpu.pipeline_mode<synchronous>, transform_indices = @transform_1, window_bounds = array<i64: 2, 8>}, {pipeline_mode = #tpu.pipeline_mode<synchronous>, transform_indices = @transform_2, window_bounds = array<i64: 16, 1>}, {pipeline_mode = #tpu.pipeline_mode<synchronous>, transform_indices = @transform_3, window_bounds = array<i64: 16, 1>}, {pipeline_mode = #tpu.pipeline_mode<synchronous>, transform_indices = @transform_4, window_bounds = array<i64: 1, 32>}, {pipeline_mode = #tpu.pipeline_mode<synchronous>, transform_indices = @transform_5, window_bounds = array<i64: 1, 32>}, {pipeline_mode = #tpu.pipeline_mode<synchronous>, transform_indices = @transform_6, window_bounds = array<i64: 1, 32>}, {pipeline_mode = #tpu.pipeline_mode<synchronous>, transform_indices = @transform_7, window_bounds = array<i64: 1, 32>}, {pipeline_mode = #tpu.pipeline_mode<synchronous>, transform_indices = @transform_8, window_bounds = array<i64: 1, 1>}, {transform_indices = @transform_9, window_bounds = array<i64: 1, 32, 96>}, {transform_indices = @transform_10, window_bounds = array<i64: 1, 1, 96>}, {transform_indices = @transform_11, window_bounds = array<i64: 1, 32, 32>}, {transform_indices = @transform_12, window_bounds = array<i64: 1, 1, 32>}, {transform_indices = @transform_13, window_bounds = array<i64: 1, 1, 32>}, {transform_indices = @transform_14, window_bounds = array<i64: 1, 1, 32>}, {transform_indices = @transform_15, window_bounds = array<i64: 1, 32, 64>}, {transform_indices = @transform_16, window_bounds = array<i64: 1, 1, 64>}, {transform_indices = @transform_17, window_bounds = array<i64: 1, 64, 32>}, {transform_indices = @transform_18, window_bounds = array<i64: 1, 1, 32>}, {transform_indices = @transform_19, window_bounds = array<i64: 1, 1, 32>}, {transform_indices = @transform_20, window_bounds = array<i64: 1, 1, 32>}, {pipeline_mode = #tpu.pipeline_mode<synchronous>, transform_indices = @transform_21, window_bounds = array<i64: 2, 1>}]} {
    %c0_i32 = arith.constant 0 : i32
    %0 = arith.cmpi eq, %arg0, %c0_i32 : i32
    %1 = arith.extui %0 : i1 to i32
    %c0_i32_0 = arith.constant 0 : i32
    %2 = arith.cmpi ne, %1, %c0_i32_0 : i32
    scf.if %2 {
      %c0_80 = arith.constant 0 : index
      %c0_81 = arith.constant 0 : index
      %184 = vector.load %arg1[%c0_80, %c0_81] : memref<16x32xf32, #tpu.memory_space<vmem>>, vector<16x32xf32>
      %c0_82 = arith.constant 0 : index
      %c0_83 = arith.constant 0 : index
      %185 = vector.load %arg5[%c0_82, %c0_83] : memref<1x32xf32, #tpu.memory_space<vmem>>, vector<1x32xf32>
      %c0_84 = arith.constant 0 : index
      %c0_85 = arith.constant 0 : index
      %186 = vector.load %arg6[%c0_84, %c0_85] : memref<1x32xf32, #tpu.memory_space<vmem>>, vector<1x32xf32>
      %cst_86 = arith.constant dense<0.000000e+00> : vector<16xf32>
      %187 = vector.multi_reduction <add>, %184, %cst_86 [1] : vector<16x32xf32> to vector<16xf32>
      %188 = vector.shape_cast %187 : vector<16xf32> to vector<16x1xf32>
      %cst_87 = arith.constant 3.200000e+01 : f32
      %189 = vector.broadcast %cst_87 : f32 to vector<16x1xf32>
      %190 = arith.divf %188, %189 : vector<16x1xf32>
      %191 = vector.broadcast %190 : vector<16x1xf32> to vector<16x32xf32>
      %192 = arith.subf %184, %191 : vector<16x32xf32>
      %193 = arith.mulf %192, %192 : vector<16x32xf32>
      %cst_88 = arith.constant dense<0.000000e+00> : vector<16xf32>
      %194 = vector.multi_reduction <add>, %193, %cst_88 [1] : vector<16x32xf32> to vector<16xf32>
      %195 = vector.shape_cast %194 : vector<16xf32> to vector<16x1xf32>
      %cst_89 = arith.constant 3.200000e+01 : f32
      %196 = vector.broadcast %cst_89 : f32 to vector<16x1xf32>
      %197 = arith.divf %195, %196 : vector<16x1xf32>
      %cst_90 = arith.constant 9.99999996E-13 : f32
      %198 = vector.broadcast %cst_90 : f32 to vector<16x1xf32>
      %199 = arith.addf %197, %198 : vector<16x1xf32>
      %200 = math.rsqrt %199 : vector<16x1xf32>
      %201 = vector.broadcast %200 : vector<16x1xf32> to vector<16x32xf32>
      %202 = arith.mulf %192, %201 : vector<16x32xf32>
      %203 = vector.broadcast %185 : vector<1x32xf32> to vector<16x32xf32>
      %204 = arith.mulf %202, %203 : vector<16x32xf32>
      %205 = vector.broadcast %186 : vector<1x32xf32> to vector<16x32xf32>
      %206 = arith.addf %204, %205 : vector<16x32xf32>
      %c0_91 = arith.constant 0 : index
      %c0_92 = arith.constant 0 : index
      %207 = vector.load %arg23[%c0_91, %c0_92] : memref<16x32xf32, #tpu.memory_space<vmem>>, vector<16x32xf32>
      tpu.vector_store %arg23[%c0_91, %c0_92], %206 {strides = array<i32>} : memref<16x32xf32, #tpu.memory_space<vmem>>, vector<16x32xf32>,
    } else {
    }
    %c0 = arith.constant 0 : index
    %c0_1 = arith.constant 0 : index
    %3 = vector.load %arg23[%c0, %c0_1] : memref<16x32xf32, #tpu.memory_space<vmem>>, vector<16x32xf32>
    %c0_2 = arith.constant 0 : index
    %c0_3 = arith.constant 0 : index
    %c0_4 = arith.constant 0 : index
    %4 = vector.load %arg10[%c0_2, %c0_3, %c0_4] : memref<1x32x96xf32, #tpu.memory_space<vmem>>, vector<1x32x96xf32>
    %5 = vector.shape_cast %4 : vector<1x32x96xf32> to vector<32x96xf32>
    %cst = arith.constant dense<0.000000e+00> : vector<16x96xf32>
    %6 = tpu.matmul %3, %5, %cst {dimension_numbers = #tpu.dot_dimension_numbers<[1], [0], [0], [1], [0, 0, 1, 1], [], []>} : vector<16x32xf32>, vector<32x96xf32>, vector<16x96xf32> -> vector<16x96xf32>
    %c0_5 = arith.constant 0 : index
    %c0_6 = arith.constant 0 : index
    %c0_7 = arith.constant 0 : index
    %7 = vector.load %arg11[%c0_5, %c0_6, %c0_7] : memref<1x1x96xf32, #tpu.memory_space<vmem>>, vector<1x1x96xf32>
    %8 = vector.shape_cast %7 : vector<1x1x96xf32> to vector<1x96xf32>
    %9 = vector.broadcast %8 : vector<1x96xf32> to vector<16x96xf32>
    %10 = arith.addf %6, %9 : vector<16x96xf32>
    %11 = vector.extract_strided_slice %10 {offsets = [0, 0], sizes = [16, 32], strides = [1, 1]} : vector<16x96xf32> to vector<16x32xf32>
    %12 = vector.extract_strided_slice %10 {offsets = [0, 32], sizes = [16, 32], strides = [1, 1]} : vector<16x96xf32> to vector<16x32xf32>
    %13 = vector.extract_strided_slice %10 {offsets = [0, 64], sizes = [16, 32], strides = [1, 1]} : vector<16x96xf32> to vector<16x32xf32>
    %c0_8 = arith.constant 0 : index
    %c0_9 = arith.constant 0 : index
    %14 = vector.load %arg2[%c0_8, %c0_9] : memref<2x8xf32, #tpu.memory_space<vmem>>, vector<2x8xf32>
    %15 = vector.extract_strided_slice %14 {offsets = [0, 0], sizes = [1, 8], strides = [1, 1]} : vector<2x8xf32> to vector<1x8xf32>
    %16 = vector.extract_strided_slice %11 {offsets = [0, 0], sizes = [8, 16], strides = [1, 1]} : vector<16x32xf32> to vector<8x16xf32>
    %17 = vector.extract_strided_slice %12 {offsets = [0, 0], sizes = [8, 16], strides = [1, 1]} : vector<16x32xf32> to vector<8x16xf32>
    %18 = vector.extract_strided_slice %13 {offsets = [0, 0], sizes = [8, 16], strides = [1, 1]} : vector<16x32xf32> to vector<8x16xf32>
    %cst_10 = arith.constant dense<0.000000e+00> : vector<8x8xf32>
    %19 = tpu.matmul %16, %17, %cst_10 {dimension_numbers = #tpu.dot_dimension_numbers<[1], [1], [0], [0], [0, 0, 1, 0], [], []>} : vector<8x16xf32>, vector<8x16xf32>, vector<8x8xf32> -> vector<8x8xf32>
    %cst_11 = arith.constant 2.500000e-01 : f32
    %20 = vector.broadcast %cst_11 : f32 to vector<8x8xf32>
    %21 = arith.mulf %19, %20 : vector<8x8xf32>
    %22 = vector.broadcast %15 : vector<1x8xf32> to vector<8x8xf32>
    %23 = arith.addf %21, %22 : vector<8x8xf32>
    %cst_12 = arith.constant dense<0xFF800000> : vector<8xf32>
    %24 = vector.multi_reduction <maximumf>, %23, %cst_12 [1] : vector<8x8xf32> to vector<8xf32>
    %25 = vector.shape_cast %24 : vector<8xf32> to vector<8x1xf32>
    %26 = vector.broadcast %25 : vector<8x1xf32> to vector<8x8xf32>
    %27 = arith.subf %23, %26 : vector<8x8xf32>
    %28 = math.exp %27 : vector<8x8xf32>
    %cst_13 = arith.constant dense<0.000000e+00> : vector<8xf32>
    %29 = vector.multi_reduction <add>, %28, %cst_13 [1] : vector<8x8xf32> to vector<8xf32>
    %30 = vector.shape_cast %29 : vector<8xf32> to vector<8x1xf32>
    %31 = tpu.reciprocal %30 {approx = true} : vector<8x1xf32> -> vector<8x1xf32>
    %32 = vector.broadcast %31 : vector<8x1xf32> to vector<8x8xf32>
    %33 = arith.mulf %28, %32 : vector<8x8xf32>
    %cst_14 = arith.constant dense<0.000000e+00> : vector<8x16xf32>
    %34 = tpu.matmul %33, %18, %cst_14 {dimension_numbers = #tpu.dot_dimension_numbers<[1], [0], [0], [1], [0, 0, 1, 1], [], []>} : vector<8x8xf32>, vector<8x16xf32>, vector<8x16xf32> -> vector<8x16xf32>
    %35 = vector.extract_strided_slice %11 {offsets = [0, 16], sizes = [8, 16], strides = [1, 1]} : vector<16x32xf32> to vector<8x16xf32>
    %36 = vector.extract_strided_slice %12 {offsets = [0, 16], sizes = [8, 16], strides = [1, 1]} : vector<16x32xf32> to vector<8x16xf32>
    %37 = vector.extract_strided_slice %13 {offsets = [0, 16], sizes = [8, 16], strides = [1, 1]} : vector<16x32xf32> to vector<8x16xf32>
    %cst_15 = arith.constant dense<0.000000e+00> : vector<8x8xf32>
    %38 = tpu.matmul %35, %36, %cst_15 {dimension_numbers = #tpu.dot_dimension_numbers<[1], [1], [0], [0], [0, 0, 1, 0], [], []>} : vector<8x16xf32>, vector<8x16xf32>, vector<8x8xf32> -> vector<8x8xf32>
    %cst_16 = arith.constant 2.500000e-01 : f32
    %39 = vector.broadcast %cst_16 : f32 to vector<8x8xf32>
    %40 = arith.mulf %38, %39 : vector<8x8xf32>
    %41 = vector.broadcast %15 : vector<1x8xf32> to vector<8x8xf32>
    %42 = arith.addf %40, %41 : vector<8x8xf32>
    %cst_17 = arith.constant dense<0xFF800000> : vector<8xf32>
    %43 = vector.multi_reduction <maximumf>, %42, %cst_17 [1] : vector<8x8xf32> to vector<8xf32>
    %44 = vector.shape_cast %43 : vector<8xf32> to vector<8x1xf32>
    %45 = vector.broadcast %44 : vector<8x1xf32> to vector<8x8xf32>
    %46 = arith.subf %42, %45 : vector<8x8xf32>
    %47 = math.exp %46 : vector<8x8xf32>
    %cst_18 = arith.constant dense<0.000000e+00> : vector<8xf32>
    %48 = vector.multi_reduction <add>, %47, %cst_18 [1] : vector<8x8xf32> to vector<8xf32>
    %49 = vector.shape_cast %48 : vector<8xf32> to vector<8x1xf32>
    %50 = tpu.reciprocal %49 {approx = true} : vector<8x1xf32> -> vector<8x1xf32>
    %51 = vector.broadcast %50 : vector<8x1xf32> to vector<8x8xf32>
    %52 = arith.mulf %47, %51 : vector<8x8xf32>
    %cst_19 = arith.constant dense<0.000000e+00> : vector<8x16xf32>
    %53 = tpu.matmul %52, %37, %cst_19 {dimension_numbers = #tpu.dot_dimension_numbers<[1], [0], [0], [1], [0, 0, 1, 1], [], []>} : vector<8x8xf32>, vector<8x16xf32>, vector<8x16xf32> -> vector<8x16xf32>
    %54 = tpu.concatenate %34, %53 in 1 : vector<8x16xf32>, vector<8x16xf32> -> vector<8x32xf32>
    %55 = vector.extract_strided_slice %14 {offsets = [1, 0], sizes = [1, 8], strides = [1, 1]} : vector<2x8xf32> to vector<1x8xf32>
    %56 = vector.extract_strided_slice %11 {offsets = [8, 0], sizes = [8, 16], strides = [1, 1]} : vector<16x32xf32> to vector<8x16xf32>
    %57 = vector.extract_strided_slice %12 {offsets = [8, 0], sizes = [8, 16], strides = [1, 1]} : vector<16x32xf32> to vector<8x16xf32>
    %58 = vector.extract_strided_slice %13 {offsets = [8, 0], sizes = [8, 16], strides = [1, 1]} : vector<16x32xf32> to vector<8x16xf32>
    %cst_20 = arith.constant dense<0.000000e+00> : vector<8x8xf32>
    %59 = tpu.matmul %56, %57, %cst_20 {dimension_numbers = #tpu.dot_dimension_numbers<[1], [1], [0], [0], [0, 0, 1, 0], [], []>} : vector<8x16xf32>, vector<8x16xf32>, vector<8x8xf32> -> vector<8x8xf32>
    %cst_21 = arith.constant 2.500000e-01 : f32
    %60 = vector.broadcast %cst_21 : f32 to vector<8x8xf32>
    %61 = arith.mulf %59, %60 : vector<8x8xf32>
    %62 = vector.broadcast %55 : vector<1x8xf32> to vector<8x8xf32>
    %63 = arith.addf %61, %62 : vector<8x8xf32>
    %cst_22 = arith.constant dense<0xFF800000> : vector<8xf32>
    %64 = vector.multi_reduction <maximumf>, %63, %cst_22 [1] : vector<8x8xf32> to vector<8xf32>
    %65 = vector.shape_cast %64 : vector<8xf32> to vector<8x1xf32>
    %66 = vector.broadcast %65 : vector<8x1xf32> to vector<8x8xf32>
    %67 = arith.subf %63, %66 : vector<8x8xf32>
    %68 = math.exp %67 : vector<8x8xf32>
    %cst_23 = arith.constant dense<0.000000e+00> : vector<8xf32>
    %69 = vector.multi_reduction <add>, %68, %cst_23 [1] : vector<8x8xf32> to vector<8xf32>
    %70 = vector.shape_cast %69 : vector<8xf32> to vector<8x1xf32>
    %71 = tpu.reciprocal %70 {approx = true} : vector<8x1xf32> -> vector<8x1xf32>
    %72 = vector.broadcast %71 : vector<8x1xf32> to vector<8x8xf32>
    %73 = arith.mulf %68, %72 : vector<8x8xf32>
    %cst_24 = arith.constant dense<0.000000e+00> : vector<8x16xf32>
    %74 = tpu.matmul %73, %58, %cst_24 {dimension_numbers = #tpu.dot_dimension_numbers<[1], [0], [0], [1], [0, 0, 1, 1], [], []>} : vector<8x8xf32>, vector<8x16xf32>, vector<8x16xf32> -> vector<8x16xf32>
    %75 = vector.extract_strided_slice %11 {offsets = [8, 16], sizes = [8, 16], strides = [1, 1]} : vector<16x32xf32> to vector<8x16xf32>
    %76 = vector.extract_strided_slice %12 {offsets = [8, 16], sizes = [8, 16], strides = [1, 1]} : vector<16x32xf32> to vector<8x16xf32>
    %77 = vector.extract_strided_slice %13 {offsets = [8, 16], sizes = [8, 16], strides = [1, 1]} : vector<16x32xf32> to vector<8x16xf32>
    %cst_25 = arith.constant dense<0.000000e+00> : vector<8x8xf32>
    %78 = tpu.matmul %75, %76, %cst_25 {dimension_numbers = #tpu.dot_dimension_numbers<[1], [1], [0], [0], [0, 0, 1, 0], [], []>} : vector<8x16xf32>, vector<8x16xf32>, vector<8x8xf32> -> vector<8x8xf32>
    %cst_26 = arith.constant 2.500000e-01 : f32
    %79 = vector.broadcast %cst_26 : f32 to vector<8x8xf32>
    %80 = arith.mulf %78, %79 : vector<8x8xf32>
    %81 = vector.broadcast %55 : vector<1x8xf32> to vector<8x8xf32>
    %82 = arith.addf %80, %81 : vector<8x8xf32>
    %cst_27 = arith.constant dense<0xFF800000> : vector<8xf32>
    %83 = vector.multi_reduction <maximumf>, %82, %cst_27 [1] : vector<8x8xf32> to vector<8xf32>
    %84 = vector.shape_cast %83 : vector<8xf32> to vector<8x1xf32>
    %85 = vector.broadcast %84 : vector<8x1xf32> to vector<8x8xf32>
    %86 = arith.subf %82, %85 : vector<8x8xf32>
    %87 = math.exp %86 : vector<8x8xf32>
    %cst_28 = arith.constant dense<0.000000e+00> : vector<8xf32>
    %88 = vector.multi_reduction <add>, %87, %cst_28 [1] : vector<8x8xf32> to vector<8xf32>
    %89 = vector.shape_cast %88 : vector<8xf32> to vector<8x1xf32>
    %90 = tpu.reciprocal %89 {approx = true} : vector<8x1xf32> -> vector<8x1xf32>
    %91 = vector.broadcast %90 : vector<8x1xf32> to vector<8x8xf32>
    %92 = arith.mulf %87, %91 : vector<8x8xf32>
    %cst_29 = arith.constant dense<0.000000e+00> : vector<8x16xf32>
    %93 = tpu.matmul %92, %77, %cst_29 {dimension_numbers = #tpu.dot_dimension_numbers<[1], [0], [0], [1], [0, 0, 1, 1], [], []>} : vector<8x8xf32>, vector<8x16xf32>, vector<8x16xf32> -> vector<8x16xf32>
    %94 = tpu.concatenate %74, %93 in 1 : vector<8x16xf32>, vector<8x16xf32> -> vector<8x32xf32>
    %95 = tpu.concatenate %54, %94 in 0 : vector<8x32xf32>, vector<8x32xf32> -> vector<16x32xf32>
    %c0_30 = arith.constant 0 : index
    %c0_31 = arith.constant 0 : index
    %c0_32 = arith.constant 0 : index
    %96 = vector.load %arg12[%c0_30, %c0_31, %c0_32] : memref<1x32x32xf32, #tpu.memory_space<vmem>>, vector<1x32x32xf32>
    %97 = vector.shape_cast %96 : vector<1x32x32xf32> to vector<32x32xf32>
    %cst_33 = arith.constant dense<0.000000e+00> : vector<16x32xf32>
    %98 = tpu.matmul %95, %97, %cst_33 {dimension_numbers = #tpu.dot_dimension_numbers<[1], [0], [0], [1], [0, 0, 1, 1], [], []>} : vector<16x32xf32>, vector<32x32xf32>, vector<16x32xf32> -> vector<16x32xf32>
    %c0_34 = arith.constant 0 : index
    %c0_35 = arith.constant 0 : index
    %c0_36 = arith.constant 0 : index
    %99 = vector.load %arg13[%c0_34, %c0_35, %c0_36] : memref<1x1x32xf32, #tpu.memory_space<vmem>>, vector<1x1x32xf32>
    %100 = vector.shape_cast %99 : vector<1x1x32xf32> to vector<1x32xf32>
    %101 = vector.broadcast %100 : vector<1x32xf32> to vector<16x32xf32>
    %102 = arith.addf %98, %101 : vector<16x32xf32>
    %103 = arith.addf %3, %102 : vector<16x32xf32>
    %c0_37 = arith.constant 0 : index
    %c0_38 = arith.constant 0 : index
    %c0_39 = arith.constant 0 : index
    %104 = vector.load %arg14[%c0_37, %c0_38, %c0_39] : memref<1x1x32xf32, #tpu.memory_space<vmem>>, vector<1x1x32xf32>
    %105 = vector.shape_cast %104 : vector<1x1x32xf32> to vector<1x32xf32>
    %c0_40 = arith.constant 0 : index
    %c0_41 = arith.constant 0 : index
    %c0_42 = arith.constant 0 : index
    %106 = vector.load %arg15[%c0_40, %c0_41, %c0_42] : memref<1x1x32xf32, #tpu.memory_space<vmem>>, vector<1x1x32xf32>
    %107 = vector.shape_cast %106 : vector<1x1x32xf32> to vector<1x32xf32>
    %cst_43 = arith.constant dense<0.000000e+00> : vector<16xf32>
    %108 = vector.multi_reduction <add>, %103, %cst_43 [1] : vector<16x32xf32> to vector<16xf32>
    %109 = vector.shape_cast %108 : vector<16xf32> to vector<16x1xf32>
    %cst_44 = arith.constant 3.200000e+01 : f32
    %110 = vector.broadcast %cst_44 : f32 to vector<16x1xf32>
    %111 = arith.divf %109, %110 : vector<16x1xf32>
    %112 = vector.broadcast %111 : vector<16x1xf32> to vector<16x32xf32>
    %113 = arith.subf %103, %112 : vector<16x32xf32>
    %114 = arith.mulf %113, %113 : vector<16x32xf32>
    %cst_45 = arith.constant dense<0.000000e+00> : vector<16xf32>
    %115 = vector.multi_reduction <add>, %114, %cst_45 [1] : vector<16x32xf32> to vector<16xf32>
    %116 = vector.shape_cast %115 : vector<16xf32> to vector<16x1xf32>
    %cst_46 = arith.constant 3.200000e+01 : f32
    %117 = vector.broadcast %cst_46 : f32 to vector<16x1xf32>
    %118 = arith.divf %116, %117 : vector<16x1xf32>
    %cst_47 = arith.constant 9.99999996E-13 : f32
    %119 = vector.broadcast %cst_47 : f32 to vector<16x1xf32>
    %120 = arith.addf %118, %119 : vector<16x1xf32>
    %121 = math.rsqrt %120 : vector<16x1xf32>
    %122 = vector.broadcast %121 : vector<16x1xf32> to vector<16x32xf32>
    %123 = arith.mulf %113, %122 : vector<16x32xf32>
    %124 = vector.broadcast %105 : vector<1x32xf32> to vector<16x32xf32>
    %125 = arith.mulf %123, %124 : vector<16x32xf32>
    %126 = vector.broadcast %107 : vector<1x32xf32> to vector<16x32xf32>
    %127 = arith.addf %125, %126 : vector<16x32xf32>
    %c0_48 = arith.constant 0 : index
    %c0_49 = arith.constant 0 : index
    %c0_50 = arith.constant 0 : index
    %128 = vector.load %arg16[%c0_48, %c0_49, %c0_50] : memref<1x32x64xf32, #tpu.memory_space<vmem>>, vector<1x32x64xf32>
    %129 = vector.shape_cast %128 : vector<1x32x64xf32> to vector<32x64xf32>
    %cst_51 = arith.constant dense<0.000000e+00> : vector<16x64xf32>
    %130 = tpu.matmul %127, %129, %cst_51 {dimension_numbers = #tpu.dot_dimension_numbers<[1], [0], [0], [1], [0, 0, 1, 1], [], []>} : vector<16x32xf32>, vector<32x64xf32>, vector<16x64xf32> -> vector<16x64xf32>
    %c0_52 = arith.constant 0 : index
    %c0_53 = arith.constant 0 : index
    %c0_54 = arith.constant 0 : index
    %131 = vector.load %arg17[%c0_52, %c0_53, %c0_54] : memref<1x1x64xf32, #tpu.memory_space<vmem>>, vector<1x1x64xf32>
    %132 = vector.shape_cast %131 : vector<1x1x64xf32> to vector<1x64xf32>
    %133 = vector.broadcast %132 : vector<1x64xf32> to vector<16x64xf32>
    %134 = arith.addf %130, %133 : vector<16x64xf32>
    %135 = arith.mulf %134, %134 : vector<16x64xf32>
    %136 = arith.mulf %134, %135 : vector<16x64xf32>
    %cst_55 = arith.constant 4.471500e-02 : f32
    %137 = vector.broadcast %cst_55 : f32 to vector<16x64xf32>
    %138 = arith.mulf %137, %136 : vector<16x64xf32>
    %139 = arith.addf %134, %138 : vector<16x64xf32>
    %cst_56 = arith.constant 0.797884583 : f32
    %140 = vector.broadcast %cst_56 : f32 to vector<16x64xf32>
    %141 = arith.mulf %140, %139 : vector<16x64xf32>
    %142 = math.tanh %141 : vector<16x64xf32>
    %cst_57 = arith.constant 1.000000e+00 : f32
    %143 = vector.broadcast %cst_57 : f32 to vector<16x64xf32>
    %144 = arith.addf %143, %142 : vector<16x64xf32>
    %cst_58 = arith.constant 5.000000e-01 : f32
    %145 = vector.broadcast %cst_58 : f32 to vector<16x64xf32>
    %146 = arith.mulf %145, %144 : vector<16x64xf32>
    %147 = arith.mulf %134, %146 : vector<16x64xf32>
    %c0_59 = arith.constant 0 : index
    %c0_60 = arith.constant 0 : index
    %c0_61 = arith.constant 0 : index
    %148 = vector.load %arg18[%c0_59, %c0_60, %c0_61] : memref<1x64x32xf32, #tpu.memory_space<vmem>>, vector<1x64x32xf32>
    %149 = vector.shape_cast %148 : vector<1x64x32xf32> to vector<64x32xf32>
    %cst_62 = arith.constant dense<0.000000e+00> : vector<16x32xf32>
    %150 = tpu.matmul %147, %149, %cst_62 {dimension_numbers = #tpu.dot_dimension_numbers<[1], [0], [0], [1], [0, 0, 1, 1], [], []>} : vector<16x64xf32>, vector<64x32xf32>, vector<16x32xf32> -> vector<16x32xf32>
    %c0_63 = arith.constant 0 : index
    %c0_64 = arith.constant 0 : index
    %c0_65 = arith.constant 0 : index
    %151 = vector.load %arg19[%c0_63, %c0_64, %c0_65] : memref<1x1x32xf32, #tpu.memory_space<vmem>>, vector<1x1x32xf32>
    %152 = vector.shape_cast %151 : vector<1x1x32xf32> to vector<1x32xf32>
    %153 = vector.broadcast %152 : vector<1x32xf32> to vector<16x32xf32>
    %154 = arith.addf %150, %153 : vector<16x32xf32>
    %155 = arith.addf %127, %154 : vector<16x32xf32>
    %c0_66 = arith.constant 0 : index
    %c0_67 = arith.constant 0 : index
    %c0_68 = arith.constant 0 : index
    %156 = vector.load %arg20[%c0_66, %c0_67, %c0_68] : memref<1x1x32xf32, #tpu.memory_space<vmem>>, vector<1x1x32xf32>
    %157 = vector.shape_cast %156 : vector<1x1x32xf32> to vector<1x32xf32>
    %c0_69 = arith.constant 0 : index
    %c0_70 = arith.constant 0 : index
    %c0_71 = arith.constant 0 : index
    %158 = vector.load %arg21[%c0_69, %c0_70, %c0_71] : memref<1x1x32xf32, #tpu.memory_space<vmem>>, vector<1x1x32xf32>
    %159 = vector.shape_cast %158 : vector<1x1x32xf32> to vector<1x32xf32>
    %cst_72 = arith.constant dense<0.000000e+00> : vector<16xf32>
    %160 = vector.multi_reduction <add>, %155, %cst_72 [1] : vector<16x32xf32> to vector<16xf32>
    %161 = vector.shape_cast %160 : vector<16xf32> to vector<16x1xf32>
    %cst_73 = arith.constant 3.200000e+01 : f32
    %162 = vector.broadcast %cst_73 : f32 to vector<16x1xf32>
    %163 = arith.divf %161, %162 : vector<16x1xf32>
    %164 = vector.broadcast %163 : vector<16x1xf32> to vector<16x32xf32>
    %165 = arith.subf %155, %164 : vector<16x32xf32>
    %166 = arith.mulf %165, %165 : vector<16x32xf32>
    %cst_74 = arith.constant dense<0.000000e+00> : vector<16xf32>
    %167 = vector.multi_reduction <add>, %166, %cst_74 [1] : vector<16x32xf32> to vector<16xf32>
    %168 = vector.shape_cast %167 : vector<16xf32> to vector<16x1xf32>
    %cst_75 = arith.constant 3.200000e+01 : f32
    %169 = vector.broadcast %cst_75 : f32 to vector<16x1xf32>
    %170 = arith.divf %168, %169 : vector<16x1xf32>
    %cst_76 = arith.constant 9.99999996E-13 : f32
    %171 = vector.broadcast %cst_76 : f32 to vector<16x1xf32>
    %172 = arith.addf %170, %171 : vector<16x1xf32>
    %173 = math.rsqrt %172 : vector<16x1xf32>
    %174 = vector.broadcast %173 : vector<16x1xf32> to vector<16x32xf32>
    %175 = arith.mulf %165, %174 : vector<16x32xf32>
    %176 = vector.broadcast %157 : vector<1x32xf32> to vector<16x32xf32>
    %177 = arith.mulf %175, %176 : vector<16x32xf32>
    %178 = vector.broadcast %159 : vector<1x32xf32> to vector<16x32xf32>
    %179 = arith.addf %177, %178 : vector<16x32xf32>
    %c0_77 = arith.constant 0 : index
    %c0_78 = arith.constant 0 : index
    %180 = vector.load %arg23[%c0_77, %c0_78] : memref<16x32xf32, #tpu.memory_space<vmem>>, vector<16x32xf32>
    tpu.vector_store %arg23[%c0_77, %c0_78], %179 {strides = array<i32>} : memref<16x32xf32, #tpu.memory_space<vmem>>, vector<16x32xf32>,
    %c1_i32 = arith.constant 1 : i32
    %181 = arith.cmpi eq, %arg0, %c1_i32 : i32
    %182 = arith.extui %181 : i1 to i32
    %c0_i32_79 = arith.constant 0 : i32
    %183 = arith.cmpi ne, %182, %c0_i32_79 : i32
    scf.if %183 {
      %c0_80 = arith.constant 0 : index
      %c0_81 = arith.constant 0 : index
      %184 = vector.load %arg3[%c0_80, %c0_81] : memref<16x1xf32, #tpu.memory_space<vmem>>, vector<16x1xf32>
      %c0_82 = arith.constant 0 : index
      %c0_83 = arith.constant 0 : index
      %185 = vector.load %arg4[%c0_82, %c0_83] : memref<16x1xf32, #tpu.memory_space<vmem>>, vector<16x1xf32>
      %c0_84 = arith.constant 0 : index
      %c0_85 = arith.constant 0 : index
      %186 = vector.load %arg7[%c0_84, %c0_85] : memref<1x32xf32, #tpu.memory_space<vmem>>, vector<1x32xf32>
      %c0_86 = arith.constant 0 : index
      %c0_87 = arith.constant 0 : index
      %187 = vector.load %arg8[%c0_86, %c0_87] : memref<1x32xf32, #tpu.memory_space<vmem>>, vector<1x32xf32>
      %c0_88 = arith.constant 0 : index
      %c0_89 = arith.constant 0 : index
      %188 = vector.load %arg9[%c0_88, %c0_89] : memref<1x1xf32, #tpu.memory_space<vmem>>, vector<1x1xf32>
      %189 = vector.extract_strided_slice %179 {offsets = [0, 0], sizes = [8, 32], strides = [1, 1]} : vector<16x32xf32> to vector<8x32xf32>
      %190 = vector.extract_strided_slice %184 {offsets = [0, 0], sizes = [8, 1], strides = [1, 1]} : vector<16x1xf32> to vector<8x1xf32>
      %191 = vector.broadcast %190 : vector<8x1xf32> to vector<8x32xf32>
      %192 = arith.mulf %189, %191 : vector<8x32xf32>
      %cst_90 = arith.constant 1.000000e+00 : f32
      %193 = vector.broadcast %cst_90 : f32 to vector<8x32xf32>
      %194 = arith.addf %192, %193 : vector<8x32xf32>
      %cst_91 = arith.constant dense<0xFF800000> : vector<32xf32>
      %195 = vector.multi_reduction <maximumf>, %194, %cst_91 [0] : vector<8x32xf32> to vector<32xf32>
      %196 = vector.shape_cast %195 : vector<32xf32> to vector<1x32xf32>
      %cst_92 = arith.constant 1.000000e+00 : f32
      %197 = vector.broadcast %cst_92 : f32 to vector<1x32xf32>
      %198 = arith.subf %196, %197 : vector<1x32xf32>
      %199 = vector.extract_strided_slice %185 {offsets = [0, 0], sizes = [8, 1], strides = [1, 1]} : vector<16x1xf32> to vector<8x1xf32>
      %200 = vector.broadcast %199 : vector<8x1xf32> to vector<8x32xf32>
      %201 = arith.mulf %189, %200 : vector<8x32xf32>
      %cst_93 = arith.constant 1.000000e+00 : f32
      %202 = vector.broadcast %cst_93 : f32 to vector<8x32xf32>
      %203 = arith.addf %201, %202 : vector<8x32xf32>
      %cst_94 = arith.constant dense<0xFF800000> : vector<32xf32>
      %204 = vector.multi_reduction <maximumf>, %203, %cst_94 [0] : vector<8x32xf32> to vector<32xf32>
      %205 = vector.shape_cast %204 : vector<32xf32> to vector<1x32xf32>
      %cst_95 = arith.constant 1.000000e+00 : f32
      %206 = vector.broadcast %cst_95 : f32 to vector<1x32xf32>
      %207 = arith.subf %205, %206 : vector<1x32xf32>
      %208 = arith.mulf %198, %186 : vector<1x32xf32>
      %cst_96 = arith.constant dense<0.000000e+00> : vector<1xf32>
      %209 = vector.multi_reduction <add>, %208, %cst_96 [1] : vector<1x32xf32> to vector<1xf32>
      %210 = vector.shape_cast %209 : vector<1xf32> to vector<1x1xf32>
      %211 = arith.mulf %207, %187 : vector<1x32xf32>
      %cst_97 = arith.constant dense<0.000000e+00> : vector<1xf32>
      %212 = vector.multi_reduction <add>, %211, %cst_97 [1] : vector<1x32xf32> to vector<1xf32>
      %213 = vector.shape_cast %212 : vector<1xf32> to vector<1x1xf32>
      %214 = arith.addf %210, %213 : vector<1x1xf32>
      %215 = arith.addf %214, %188 : vector<1x1xf32>
      %216 = vector.extract_strided_slice %179 {offsets = [8, 0], sizes = [8, 32], strides = [1, 1]} : vector<16x32xf32> to vector<8x32xf32>
      %217 = vector.extract_strided_slice %184 {offsets = [8, 0], sizes = [8, 1], strides = [1, 1]} : vector<16x1xf32> to vector<8x1xf32>
      %218 = vector.broadcast %217 : vector<8x1xf32> to vector<8x32xf32>
      %219 = arith.mulf %216, %218 : vector<8x32xf32>
      %cst_98 = arith.constant 1.000000e+00 : f32
      %220 = vector.broadcast %cst_98 : f32 to vector<8x32xf32>
      %221 = arith.addf %219, %220 : vector<8x32xf32>
      %cst_99 = arith.constant dense<0xFF800000> : vector<32xf32>
      %222 = vector.multi_reduction <maximumf>, %221, %cst_99 [0] : vector<8x32xf32> to vector<32xf32>
      %223 = vector.shape_cast %222 : vector<32xf32> to vector<1x32xf32>
      %cst_100 = arith.constant 1.000000e+00 : f32
      %224 = vector.broadcast %cst_100 : f32 to vector<1x32xf32>
      %225 = arith.subf %223, %224 : vector<1x32xf32>
      %226 = vector.extract_strided_slice %185 {offsets = [8, 0], sizes = [8, 1], strides = [1, 1]} : vector<16x1xf32> to vector<8x1xf32>
      %227 = vector.broadcast %226 : vector<8x1xf32> to vector<8x32xf32>
      %228 = arith.mulf %216, %227 : vector<8x32xf32>
      %cst_101 = arith.constant 1.000000e+00 : f32
      %229 = vector.broadcast %cst_101 : f32 to vector<8x32xf32>
      %230 = arith.addf %228, %229 : vector<8x32xf32>
      %cst_102 = arith.constant dense<0xFF800000> : vector<32xf32>
      %231 = vector.multi_reduction <maximumf>, %230, %cst_102 [0] : vector<8x32xf32> to vector<32xf32>
      %232 = vector.shape_cast %231 : vector<32xf32> to vector<1x32xf32>
      %cst_103 = arith.constant 1.000000e+00 : f32
      %233 = vector.broadcast %cst_103 : f32 to vector<1x32xf32>
      %234 = arith.subf %232, %233 : vector<1x32xf32>
      %235 = arith.mulf %225, %186 : vector<1x32xf32>
      %cst_104 = arith.constant dense<0.000000e+00> : vector<1xf32>
      %236 = vector.multi_reduction <add>, %235, %cst_104 [1] : vector<1x32xf32> to vector<1xf32>
      %237 = vector.shape_cast %236 : vector<1xf32> to vector<1x1xf32>
      %238 = arith.mulf %234, %187 : vector<1x32xf32>
      %cst_105 = arith.constant dense<0.000000e+00> : vector<1xf32>
      %239 = vector.multi_reduction <add>, %238, %cst_105 [1] : vector<1x32xf32> to vector<1xf32>
      %240 = vector.shape_cast %239 : vector<1xf32> to vector<1x1xf32>
      %241 = arith.addf %237, %240 : vector<1x1xf32>
      %242 = arith.addf %241, %188 : vector<1x1xf32>
      %243 = tpu.concatenate %215, %242 in 0 : vector<1x1xf32>, vector<1x1xf32> -> vector<2x1xf32>
      %c0_106 = arith.constant 0 : index
      %c0_107 = arith.constant 0 : index
      %244 = vector.load %arg22[%c0_106, %c0_107] : memref<2x1xf32, #tpu.memory_space<vmem>>, vector<2x1xf32>
      tpu.vector_store %arg22[%c0_106, %c0_107], %243 {strides = array<i32>} : memref<2x1xf32, #tpu.memory_space<vmem>>, vector<2x1xf32>,
    } else {
    }
    return
  }
  func.func @transform_0(%arg0: i32) -> (i32, i32) {
    %c0_i32 = arith.constant 0 : i32
    %c0_i32_0 = arith.constant 0 : i32
    %c0_i32_1 = arith.constant 0 : i32
    return %c0_i32, %c0_i32_0 : i32, i32
  }
  func.func @transform_1(%arg0: i32) -> (i32, i32) {
    %c0_i32 = arith.constant 0 : i32
    %c0_i32_0 = arith.constant 0 : i32
    %c0_i32_1 = arith.constant 0 : i32
    return %c0_i32, %c0_i32_0 : i32, i32
  }
  func.func @transform_2(%arg0: i32) -> (i32, i32) {
    %c0_i32 = arith.constant 0 : i32
    %c0_i32_0 = arith.constant 0 : i32
    %c0_i32_1 = arith.constant 0 : i32
    return %c0_i32, %c0_i32_0 : i32, i32
  }
  func.func @transform_3(%arg0: i32) -> (i32, i32) {
    %c0_i32 = arith.constant 0 : i32
    %c0_i32_0 = arith.constant 0 : i32
    %c0_i32_1 = arith.constant 0 : i32
    return %c0_i32, %c0_i32_0 : i32, i32
  }
  func.func @transform_4(%arg0: i32) -> (i32, i32) {
    %c0_i32 = arith.constant 0 : i32
    %c0_i32_0 = arith.constant 0 : i32
    %c0_i32_1 = arith.constant 0 : i32
    return %c0_i32, %c0_i32_0 : i32, i32
  }
  func.func @transform_5(%arg0: i32) -> (i32, i32) {
    %c0_i32 = arith.constant 0 : i32
    %c0_i32_0 = arith.constant 0 : i32
    %c0_i32_1 = arith.constant 0 : i32
    return %c0_i32, %c0_i32_0 : i32, i32
  }
  func.func @transform_6(%arg0: i32) -> (i32, i32) {
    %c0_i32 = arith.constant 0 : i32
    %c0_i32_0 = arith.constant 0 : i32
    %c0_i32_1 = arith.constant 0 : i32
    return %c0_i32, %c0_i32_0 : i32, i32
  }
  func.func @transform_7(%arg0: i32) -> (i32, i32) {
    %c0_i32 = arith.constant 0 : i32
    %c0_i32_0 = arith.constant 0 : i32
    %c0_i32_1 = arith.constant 0 : i32
    return %c0_i32, %c0_i32_0 : i32, i32
  }
  func.func @transform_8(%arg0: i32) -> (i32, i32) {
    %c0_i32 = arith.constant 0 : i32
    %c0_i32_0 = arith.constant 0 : i32
    %c0_i32_1 = arith.constant 0 : i32
    return %c0_i32, %c0_i32_0 : i32, i32
  }
  func.func @transform_9(%arg0: i32) -> (i32, i32, i32) {
    %c0_i32 = arith.constant 0 : i32
    %c0_i32_0 = arith.constant 0 : i32
    %c0_i32_1 = arith.constant 0 : i32
    return %arg0, %c0_i32, %c0_i32_0 : i32, i32, i32
  }
  func.func @transform_10(%arg0: i32) -> (i32, i32, i32) {
    %c0_i32 = arith.constant 0 : i32
    %c0_i32_0 = arith.constant 0 : i32
    %c0_i32_1 = arith.constant 0 : i32
    return %arg0, %c0_i32, %c0_i32_0 : i32, i32, i32
  }
  func.func @transform_11(%arg0: i32) -> (i32, i32, i32) {
    %c0_i32 = arith.constant 0 : i32
    %c0_i32_0 = arith.constant 0 : i32
    %c0_i32_1 = arith.constant 0 : i32
    return %arg0, %c0_i32, %c0_i32_0 : i32, i32, i32
  }
  func.func @transform_12(%arg0: i32) -> (i32, i32, i32) {
    %c0_i32 = arith.constant 0 : i32
    %c0_i32_0 = arith.constant 0 : i32
    %c0_i32_1 = arith.constant 0 : i32
    return %arg0, %c0_i32, %c0_i32_0 : i32, i32, i32
  }
  func.func @transform_13(%arg0: i32) -> (i32, i32, i32) {
    %c0_i32 = arith.constant 0 : i32
    %c0_i32_0 = arith.constant 0 : i32
    %c0_i32_1 = arith.constant 0 : i32
    return %arg0, %c0_i32, %c0_i32_0 : i32, i32, i32
  }
  func.func @transform_14(%arg0: i32) -> (i32, i32, i32) {
    %c0_i32 = arith.constant 0 : i32
    %c0_i32_0 = arith.constant 0 : i32
    %c0_i32_1 = arith.constant 0 : i32
    return %arg0, %c0_i32, %c0_i32_0 : i32, i32, i32
  }
  func.func @transform_15(%arg0: i32) -> (i32, i32, i32) {
    %c0_i32 = arith.constant 0 : i32
    %c0_i32_0 = arith.constant 0 : i32
    %c0_i32_1 = arith.constant 0 : i32
    return %arg0, %c0_i32, %c0_i32_0 : i32, i32, i32
  }
  func.func @transform_16(%arg0: i32) -> (i32, i32, i32) {
    %c0_i32 = arith.constant 0 : i32
    %c0_i32_0 = arith.constant 0 : i32
    %c0_i32_1 = arith.constant 0 : i32
    return %arg0, %c0_i32, %c0_i32_0 : i32, i32, i32
  }
  func.func @transform_17(%arg0: i32) -> (i32, i32, i32) {
    %c0_i32 = arith.constant 0 : i32
    %c0_i32_0 = arith.constant 0 : i32
    %c0_i32_1 = arith.constant 0 : i32
    return %arg0, %c0_i32, %c0_i32_0 : i32, i32, i32
  }
  func.func @transform_18(%arg0: i32) -> (i32, i32, i32) {
    %c0_i32 = arith.constant 0 : i32
    %c0_i32_0 = arith.constant 0 : i32
    %c0_i32_1 = arith.constant 0 : i32
    return %arg0, %c0_i32, %c0_i32_0 : i32, i32, i32
  }
  func.func @transform_19(%arg0: i32) -> (i32, i32, i32) {
    %c0_i32 = arith.constant 0 : i32
    %c0_i32_0 = arith.constant 0 : i32
    %c0_i32_1 = arith.constant 0 : i32
    return %arg0, %c0_i32, %c0_i32_0 : i32, i32, i32
  }
  func.func @transform_20(%arg0: i32) -> (i32, i32, i32) {
    %c0_i32 = arith.constant 0 : i32
    %c0_i32_0 = arith.constant 0 : i32
    %c0_i32_1 = arith.constant 0 : i32
    return %arg0, %c0_i32, %c0_i32_0 : i32, i32, i32
  }
  func.func @transform_21(%arg0: i32) -> (i32, i32) {
    %c0_i32 = arith.constant 0 : i32
    %c0_i32_0 = arith.constant 0 : i32
    %c0_i32_1 = arith.constant 0 : i32
    return %c0_i32, %c0_i32_0 : i32, i32
  }
}

</mosaic_0001>

<bundles_post_ra>
// kernel: generator_forward.1
= control target key start
LH: loop header
LB: loop body
LE: loop exit
PB: predicated region body
PF: predicated region fallthrough
CT: control target
= control target key end

     0   :  { %s2652_s26 = smov 0   ;;  %s2927_s0 = inlined_call_operand.vmem [shape: f32[16,32], index: 0, kind: input, shape index: {}]   ;;  %s2928_s1 = inlined_call_operand.vmem [shape: f32[2,8], index: 1, kind: input, shape index: {}]   ;;  %s2929_s2 = inlined_call_operand.vmem [shape: f32[16,1], index: 2, kind: input, shape index: {}]   ;;  %s2930_s3 = inlined_call_operand.vmem [shape: f32[16,1], index: 3, kind: input, shape index: {}]   ;;  %s2931_s4 = inlined_call_operand.vmem [shape: f32[1,32], index: 4, kind: input, shape index: {}]   ;;  %s2932_s5 = inlined_call_operand.vmem [shape: f32[1,32], index: 5, kind: input, shape index: {}]   ;;  %s2933_s6 = inlined_call_operand.vmem [shape: f32[1,32], index: 6, kind: input, shape index: {}]   ;;  %s2934_s7 = inlined_call_operand.vmem [shape: f32[1,32], index: 7, kind: input, shape index: {}]   ;;  %s2935_s8 = inlined_call_operand.<no memory space> [shape: f32[1,1], index: 8, kind: input, shape index: {}]   ;;  %s2936_s9 = inlined_call_operand.vmem [shape: f32[2,32,96], index: 9, kind: input, shape index: {}]   ;;  %s2937_s10 = inlined_call_operand.vmem [shape: f32[2,1,96], index: 10, kind: input, shape index: {}]   ;;  %s2938_s11 = inlined_call_operand.vmem [shape: f32[2,32,32], index: 11, kind: input, shape index: {}]   ;;  %s2939_s12 = inlined_call_operand.vmem [shape: f32[2,1,32], index: 12, kind: input, shape index: {}]   ;;  %s2940_s13 = inlined_call_operand.vmem [shape: f32[2,1,32], index: 13, kind: input, shape index: {}]   ;;  %s2941_s14 = inlined_call_operand.vmem [shape: f32[2,1,32], index: 14, kind: input, shape index: {}]   ;;  %s2942_s15 = inlined_call_operand.vmem [shape: f32[2,32,64], index: 15, kind: input, shape index: {}]   ;;  %s2943_s16 = inlined_call_operand.vmem [shape: f32[2,1,64], index: 16, kind: input, shape index: {}]   ;;  %s2944_s17 = inlined_call_operand.vmem [shape: f32[2,64,32], index: 17, kind: input, shape index: {}]   ;;  %s2945_s18 = inlined_call_operand.vmem [shape: f32[2,1,32], index: 18, kind: input, shape index: {}]   ;;  %s2946_s19 = inlined_call_operand.vmem [shape: f32[2,1,32], index: 19, kind: input, shape index: {}]   ;;  %s2947_s20 = inlined_call_operand.vmem [shape: f32[2,1,32], index: 20, kind: input, shape index: {}]   ;;  %s2948_s21 = inlined_call_operand.vmem [shape: f32[2,1], index: 21, kind: output, shape index: {}]  }
   0x1   :  { %2953 = sst [smem:[#allocation5_spill]] %s2927_s0  ;;  %v26_v0 = vstv %s2935_s8 }
   0x2   :  { %2954 = sst [smem:[#allocation6_spill]] %s2928_s1  ;;  %27 = vst [vmem:[#allocation3] sm:$0x1] %v26_v0 }
   0x3   :  { %2955 = sst [smem:[#allocation7_spill]] %s2929_s2 }
   0x4   :  { %2956 = sst [smem:[#allocation8_spill]] %s2930_s3 }
   0x5   :  { %2957 = sst [smem:[#allocation9_spill]] %s2931_s4 }
   0x6   :  { %2958 = sst [smem:[#allocation10_spill]] %s2932_s5 }
   0x7   :  { %2959 = sst [smem:[#allocation11_spill]] %s2933_s6 }
   0x8   :  { %2960 = sst [smem:[#allocation12_spill]] %s2934_s7 }
   0x9   :  { %2961 = sst [smem:[#allocation13_spill]] %s2936_s9 }
   0xa   :  { %2962 = sst [smem:[#allocation14_spill]] %s2938_s11 }
   0xb   :  { %2963 = sst [smem:[#allocation15_spill]] %s2948_s21 }
   0xc LB: > { %2964 = sst [smem:[#allocation4_spill]] %s2528_s26  ;;  %s2658_s27 = sadd.s32 4294967295, %s2528_s26   ;;  %s2528_s26 = sphi %s2652_s26, %s33_s26  }
   0xd   : > { %p2284_p0 = scmp.ge.s32.totalorder %s2528_s26, 1  ;;  %p678_p1 = scmp.lt.s32.totalorder %s2528_s26, 3 }
   0xf   : > { %p679_p2 = pnand %p2284_p0, %p678_p1 }
  0x10   : > { %p772_p3 = scmp.lt.s32.totalorder (!%p679_p2), %s2658_s27, 1  ;;  %s2965_s9 = sld [smem:[#allocation13_spill]] (!%p679_p2) }
  0x11   : > { %682 = sbr.rel (%p679_p2) target bundleno = 3049 (0xbe9), region = 104  ;;  %s2966_s11 = sld [smem:[#allocation14_spill]] (!%p679_p2) }
  0x12   : > { %p2293_p4 = scmp.ne.s32.totalorder (!%p679_p2), %s2658_s27, 0 }
  0x16   : > { %s2664_s8 = scalar_select %p772_p3, %s2658_s27, 1 }
  0x17   : > { %s2967_s24 = sld [smem:[#allocation5_spill]] (!%p2293_p4) }
  0x18   : > { %s2331_s3 = sshll.u32 %s2664_s8, 5  ;;  %s2334_s6 = sshll.u32 %s2664_s8, 6 }
  0x19   : > { %s2674_s5 = scalar_lea.vmem %s2965_s9, %s2331_s3  ;;  %s2679_s1 = scalar_lea.vmem %s2966_s11, %s2331_s3 }
  0x1a   : > { %s2696_s9 = scalar_lea.vmem %s2942_s15, %s2331_s3  ;;  %s801_s11 = scalar_lea.vmem %s2943_s16, %s2664_s8 }
  0x1b   : > { %s2706_s25 = scalar_lea.vmem %s2944_s17, %s2334_s6  ;;  %s809_s28 = scalar_lea.vmem %s2945_s18, %s2664_s8 }
  0x1c   : > { %s812_s4 = scalar_lea.vmem %s2946_s19, %s2664_s8  ;;  %s815_s7 = scalar_lea.vmem %s2947_s20, %s2664_s8 }
  0x1d   : > { %819 = sbr.rel (%p2293_p4) target bundleno = 348 (0x15c), region = 108  ;;  %s2968_s26 = sld [smem:[#allocation9_spill]] (!%p2293_p4) }
  0x1e   : > { %s2969_s30 = sld [smem:[#allocation10_spill]] (!%p2293_p4) }
  0x22   : > { %v820_v1 = vld [vmem:[%s2967_s24] sm:$0xff]  ;;  %vm824_vm0 = vcmask 261120   ;;  %v821_v2 = vld [vmem:[%s2967_s24 + $0x8] sm:$0xff] }
  0x23   : > { %v825_v3 = vsel %vm824_vm0, %v820_v1, 0.0  ;;  %v828_v4 = vsel %vm824_vm0, %v821_v2, 0.0  ;;  %v2294_v22 = vld [vmem:[%s2968_s26] ss:$0 sm:$0xff] }
  0x24   : > { %826 = vadd.xlane.f32.xlu0 %v825_v3  ;;  %v2295_v24 = vld [vmem:[%s2969_s30] ss:$0 sm:$0xff] }
  0x28   : > { %829 = vadd.xlane.f32.xlu0 %v828_v4 }
  0xad   : > { %v827_v5 = vpop.xlane.xlu0 %826 }
  0xae   : > { %v832_v6 = vmul.f32 0.03125, %v827_v5 }
  0xb0   : > { %v834_v7 = vsub.f32 %v820_v1, %v832_v6 }
  0xb1   : > { %v830_v8 = vpop.xlane.xlu0 %829 }
  0xb2   : > { %v833_v9 = vmul.f32 0.03125, %v830_v8  ;;  %v836_v10 = vmul.f32 %v834_v7, %v834_v7 }
  0xb4   : > { %v835_v11 = vsub.f32 %v821_v2, %v833_v9  ;;  %v838_v12 = vsel %vm824_vm0, %v836_v10, 0.0 }
  0xb5   : > { %839 = vadd.xlane.f32.xlu1 %v838_v12 }
  0xb6   : > { %v837_v13 = vmul.f32 %v835_v11, %v835_v11 }
  0xb8   : > { %v841_v14 = vsel %vm824_vm0, %v837_v13, 0.0 }
  0xb9   : > { %842 = vadd.xlane.f32.xlu1 %v841_v14 }
 0x13e   : > { %v840_v15 = vpop.xlane.xlu1 %839 }
 0x13f   : > { %v844_v16 = vmul.f32 0.03125, %v840_v15 }
 0x141   : > { %v846_v17 = vadd.f32 1e-12, %v844_v16 }
 0x142   : > { %v843_v18 = vpop.xlane.xlu1 %842 }
 0x143   : > { %2488 = vrsqrt.f32 %v846_v17  ;;  %v845_v19 = vmul.f32 0.03125, %v843_v18 }
 0x145   : > { %v847_v20 = vadd.f32 1e-12, %v845_v19 }
 0x147   : > { %2490 = vrsqrt.f32 %v847_v20 }
 0x150   : > { %v2489_v21 = vpop.eup %2488 }
 0x151   : > { %v850_v23 = vmul.f32 %v2489_v21, %v834_v7 }
 0x153   : > { %v858_v25 = vmul.f32 %v2294_v22, %v850_v23 }
 0x154   : > { %v2491_v26 = vpop.eup %2490 }
 0x155   : > { %v866_v27 = vadd.f32 %v2295_v24, %v858_v25  ;;  %v851_v28 = vmul.f32 %v2491_v26, %v835_v11 }
 0x157   : > { %868 = vst.msk [vmem:[#allocation2] sm:$0xff] %vm824_vm0, %v866_v27  ;;  %v859_v29 = vmul.f32 %v2294_v22, %v851_v28 }
 0x159   : > { %v867_v30 = vadd.f32 %v2295_v24, %v859_v29 }
 0x15b   : > { %869 = vst.msk [vmem:[#allocation2 + $0x8] sm:$0xff] %vm824_vm0, %v867_v30 }
 0x15c PF: > { %v875_v31 = vld [vmem:[%s2674_s5 + $0x18] sm:$0xff]  ;;  %v874_v32 = vld [vmem:[%s2674_s5 + $0x10] sm:$0xff]  ;;  %vm883_vm1 = vcmask 261120   ;;  %v873_v34 = vld [vmem:[%s2674_s5 + $0x8] sm:$0xff]  ;;  %v2530_v37 = vmov 0.0   ;;  %vm2531_vm2 = vmmov 0   ;;  %s2970_s23 = scalar_lea.vmem %s2937_s10, %s2664_s8  ;;  %v1045_v49 = vlaneseq  ;;  %s2974_s26 = scalar_lea.vmem %s2941_s14, %s2664_s8 }
 0x15d   : > { %2379 = vmatprep.subr.mxu1 %v875_v31  ;;  %v872_v35 = vld [vmem:[%s2674_s5] sm:$0xff]  ;;  %2400 = vmatprep.subr.mxu0 %v2530_v37  ;;  %s2532_s6 = smov 112   ;;  %s2533_s2 = smov 96   ;;  %vm969_vm3 = vcmask 130048   ;;  %vm1050_vm4 = vcmask 64512   ;;  %vm1916_vm5 = vcmask 523264  }
 0x15e   : > { %v2741_v33 = vld [vmem:[#allocation2] sm:$0xff]  ;;  %2380 = vmatpush3.msra.mxu1 %v875_v31  ;;  %2402 = vmatprep.mubr.msk.f32.mxu0 %vm2531_vm2, %v2530_v37  ;;  %s2534_s0 = smov 80   ;;  %v1046_v50 = vshrl.u32 %v1045_v49, 7  ;;  %s2971_s29 = sld [smem:[#allocation6_spill]] }
 0x15f   : > { %2387 = vmatprep.mubr.msk.f32.mxu1 %vm883_vm1, %v2741_v33  ;;  %2381 = vmatprep.subr.mxu1 %v874_v32  ;;  %v2296_v39 = vld [vmem:[%s2970_s23] ss:$0 sm:$0xff]  ;;  %s2535_s3 = smov 64   ;;  %s2536_s30 = smov 48  }
 0x160   : > { %2382 = vmatpush3.msra.mxu1 %v874_v32  ;;  %v1047_v51 = vsub.s32 0, %v1046_v50  ;;  %v1390_v58 = vsub.s32 1, %v1046_v50  ;;  %s2537_s5 = smov 16   ;;  %s2972_s23 = scalar_lea.vmem %s2939_s12, %s2664_s8 }
 0x161   : > { %2383 = vmatprep.subr.mxu1 %v873_v34  ;;  %p2324_p5 = scmp.ne.s32.totalorder %s2658_s27, 1 }
 0x162   : > { %2384 = vmatpush3.msra.mxu1 %v873_v34  ;;  %v2747_v36 = vld [vmem:[#allocation2 + $0x8] sm:$0xff] }
 0x163   : > { %2385 = vmatprep.subr.mxu1 %v872_v35 }
 0x164   : > { %2386 = vmatpush3.msra.mxu1 %v872_v35  ;;  %v965_v52 = vld [vmem:[%s2971_s29] sm:$0x3]  ;;  %s2977_s29 = sld [smem:[#allocation11_spill]] (!%p2324_p5) }
 0x165   : > { %2388 = vmatmul.mubr.msk.f32.vlgmr.msra.gmra.mxu1 %vm883_vm1, %v2747_v36  ;;  %2390 = vmatprep.subr.mxu1 %v2530_v37  ;;  %v1048_v53 = vrot.slane %v965_v52, %v1047_v51  ;;  %v1391_v0 = vrot.slane %v965_v52, %v1390_v58  ;;  %v1655_v51 = vld [vmem:[%s2679_s1 + $0x18] sm:$0xff]  ;;  %v1654_v52 = vld [vmem:[%s2679_s1 + $0x10] sm:$0xff] }
 0x166   : > { %2392 = vmatprep.mubr.msk.f32.mxu1 %vm2531_vm2, %v2530_v37 }
 0x225   : > { %v2389_v38 = vpop.f32.mrf.mxu1 }
 0x226   : > { %v2766_v42 = vadd.f32 %v2389_v38, %v2296_v39 }
 0x227   : > { %v956_v40 = vpop.f32.mrf.mxu1 }
 0x228   : > { %v2762_v41 = vadd.f32 %v2296_v39, %v956_v40 }
 0x22a   : > { %1138 = vrot.lane.b32.xlu1 %v2762_v41, %s2532_s6  ;;  %967 = vrot.lane.b32.xlu0 %v2762_v41, %s2533_s2 }
 0x22e   : > { %1311 = vrot.lane.b32.xlu1 %v2766_v42, %s2533_s2  ;;  %1140 = vrot.lane.b32.xlu0 %v2762_v41, %s2534_s0 }
 0x232   : > { %1480 = vrot.lane.b32.xlu1 %v2766_v42, %s2532_s6  ;;  %1482 = vrot.lane.b32.xlu0 %v2766_v42, %s2534_s0  ;;  %s2973_s0 = scalar_lea.vmem %s2940_s13, %s2664_s8 }
 0x29c   : > { %v968_v43 = vpop.permute.xlu0 %967  ;;  %v1139_v44 = vpop.permute.xlu1 %1138 }
 0x29d   : > { %2391 = vmatpush3.xpose.msk.msra.mxu1 %vm969_vm3, %v968_v43 }
 0x29e   : > { %2395 = vmatprep.subr.mxu1 %v2530_v37 }
 0x2a0   : > { %2393 = vmatmul.mubr.msk.f32.vlgmr.msra.gmra.mxu1 %vm969_vm3, %v2762_v41  ;;  %v1141_v45 = vpop.permute.xlu0 %1140  ;;  %v1312_v46 = vpop.permute.xlu1 %1311 }
 0x2a1   : > { %2401 = vmatpush3.xpose.msk.msra.mxu0 %vm969_vm3, %v1141_v45  ;;  %2397 = vmatprep.mubr.msk.f32.mxu1 %vm2531_vm2, %v2530_v37 }
 0x2a2   : > { %2410 = vmatprep.subr.mxu0 %v2530_v37 }
 0x2a4   : > { %2403 = vmatmul.mubr.msk.f32.vlgmr.msra.gmra.mxu0 %vm969_vm3, %v1139_v44  ;;  %v1483_v47 = vpop.permute.xlu0 %1482  ;;  %v1481_v48 = vpop.permute.xlu1 %1480 }
 0x2a5   : > { %2411 = vmatpush3.xpose.msk.msra.mxu0 %vm969_vm3, %v1312_v46  ;;  %2412 = vmatprep.mubr.msk.f32.mxu0 %vm2531_vm2, %v2530_v37 }
 0x2a6   : > { %2420 = vmatprep.subr.mxu0 %v2530_v37 }
 0x2a8   : > { %2413 = vmatmul.mubr.msk.f32.vlgmr.msra.gmra.mxu0 %vm969_vm3, %v2766_v42 }
 0x2a9   : > { %2421 = vmatpush3.xpose.msk.msra.mxu0 %vm969_vm3, %v1483_v47  ;;  %2422 = vmatprep.mubr.msk.f32.mxu0 %vm2531_vm2, %v2530_v37 }
 0x2aa   : > { %2430 = vmatprep.subr.mxu0 %v1655_v51 }
 0x2ac   : > { %2423 = vmatmul.mubr.msk.f32.vlgmr.msra.gmra.mxu0 %vm969_vm3, %v1481_v48 }
 0x2ad   : > { %2431 = vmatpush3.msra.mxu0 %v1655_v51 }
 0x2ae   : > { %2432 = vmatprep.subr.mxu0 %v1654_v52 }
 0x2af   : > { %2433 = vmatpush3.msra.mxu0 %v1654_v52 }
 0x360   : > { %v1040_v54 = vpop.f32.mrf.mxu1 }
 0x361   : > { %v1044_v55 = vmul.f32 0.25, %v1040_v54  ;;  %v1652_v54 = vld [vmem:[%s2679_s1] sm:$0xff] }
 0x362   : > { %v2394_v56 = vpop.f32.mrf.mxu1 }
 0x363   : > { %v1049_v57 = vadd.f32 %v1048_v53, %v1044_v55 }
 0x364   : > { %v1212_v59 = vpop.f32.mrf.mxu0 }
 0x365   : > { %v1216_v60 = vmul.f32 0.25, %v1212_v59  ;;  %v1051_v61 = vsel %vm1050_vm4, %v1049_v57, -inf }
 0x366   : > { %1052 = vmax.xlane.f32.xlu0 %v1051_v61  ;;  %v2404_v62 = vpop.f32.mrf.mxu0 }
 0x367   : > { %v1217_v63 = vadd.f32 %v1216_v60, %v1048_v53  ;;  %v1653_v53 = vld [vmem:[%s2679_s1 + $0x8] sm:$0xff] }
 0x368   : > { %v1383_v1 = vpop.f32.mrf.mxu0  ;;  %2434 = vmatprep.subr.mxu0 %v1653_v53 }
 0x369   : > { %v1387_v2 = vmul.f32 0.25, %v1383_v1  ;;  %v1218_v3 = vsel %vm1050_vm4, %v1217_v63, -inf  ;;  %2435 = vmatpush3.msra.mxu0 %v1653_v53 }
 0x36a   : > { %1219 = vmax.xlane.f32.xlu1 %v1218_v3  ;;  %v2414_v4 = vpop.f32.mrf.mxu0  ;;  %2436 = vmatprep.subr.mxu0 %v1652_v54 }
 0x36b   : > { %v1392_v5 = vadd.f32 %v1391_v0, %v1387_v2  ;;  %2437 = vmatpush3.msra.mxu0 %v1652_v54  ;;  %v2311_v2 = vld [vmem:[%s2972_s23] ss:$0 sm:$0xff]  ;;  %s2975_s23 = sld [smem:[#allocation7_spill]] (!%p2324_p5) }
 0x36c   : > { %v1554_v6 = vpop.f32.mrf.mxu0 }
 0x36d   : > { %v1558_v7 = vmul.f32 0.25, %v1554_v6  ;;  %v1393_v8 = vsel %vm1050_vm4, %v1392_v5, -inf }
 0x36e   : > { %1394 = vmax.xlane.f32.xlu0 %v1393_v8  ;;  %v2424_v9 = vpop.f32.mrf.mxu0 }
 0x36f   : > { %v1559_v10 = vadd.f32 %v1558_v7, %v1391_v0 }
 0x371   : > { %v1560_v11 = vsel %vm1050_vm4, %v1559_v10, -inf }
 0x372   : > { %1561 = vmax.xlane.f32.xlu0 %v1560_v11 }
 0x37b   : > { %1062 = vrot.lane.b32.xlu1 %v2762_v41, %s2535_s3 }
 0x3ef   : > { %v1053_v12 = vpop.xlane.xlu0 %1052 }
 0x3f0   : > { %v1054_v13 = vsub.f32 %v1049_v57, %v1053_v12 }
 0x3f2   : > { %v1055_v14 = vmul.f32 1.442695, %v1054_v13 }
 0x3f3   : > { %v1220_v15 = vpop.xlane.xlu1 %1219 }
 0x3f4   : > { %2492 = vpow2.f32 %v1055_v14  ;;  %v1221_v16 = vsub.f32 %v1217_v63, %v1220_v15 }
 0x3f6   : > { %v1222_v17 = vmul.f32 1.442695, %v1221_v16 }
 0x3f7   : > { %v1063_v18 = vpop.permute.xlu1 %1062  ;;  %v1395_v19 = vpop.xlane.xlu0 %1394 }
 0x3f8   : > { %2494 = vpow2.f32 %v1222_v17  ;;  %v1396_v20 = vsub.f32 %v1392_v5, %v1395_v19  ;;  %2396 = vmatpush3.msra.mxu1 %v1063_v18  ;;  %v1794_v19 = vld [vmem:[%s2696_s9 + $0x18] sm:$0xff] }
 0x3f9   : > { %2405 = vmatprep.subr.mxu1 %v2530_v37 }
 0x3fa   : > { %v1397_v21 = vmul.f32 1.442695, %v1396_v20  ;;  %v1793_v20 = vld [vmem:[%s2696_s9 + $0x10] sm:$0xff] }
 0x3fb   : > { %v1562_v22 = vpop.xlane.xlu0 %1561 }
 0x3fc   : > { %2496 = vpow2.f32 %v1397_v21  ;;  %v1563_v23 = vsub.f32 %v1559_v10, %v1562_v22  ;;  %v1792_v21 = vld [vmem:[%s2696_s9 + $0x8] sm:$0xff]  ;;  %v1791_v22 = vld [vmem:[%s2696_s9] sm:$0xff] }
 0x3fe   : > { %v1564_v24 = vmul.f32 1.442695, %v1563_v23 }
 0x400   : > { %2498 = vpow2.f32 %v1564_v24 }
 0x401   : > { %v2493_v25 = vpop.eup %2492 }
 0x402   : > { %v1057_v26 = vsel %vm1050_vm4, %v2493_v25, 0.0 }
 0x403   : > { %1058 = vadd.xlane.f32.xlu1 %v1057_v26 }
 0x405   : > { %v2495_v27 = vpop.eup %2494 }
 0x406   : > { %v1224_v28 = vsel %vm1050_vm4, %v2495_v27, 0.0 }
 0x407   : > { %1225 = vadd.xlane.f32.xlu0 %v1224_v28 }
 0x409   : > { %v2497_v29 = vpop.eup %2496 }
 0x40a   : > { %v1399_v30 = vsel %vm1050_vm4, %v2497_v29, 0.0 }
 0x40b   : > { %1400 = vadd.xlane.f32.xlu1 %v1399_v30  ;;  %v2314_v30 = vld [vmem:[%s2973_s0] ss:$0 sm:$0xff]  ;;  %s2976_s0 = sld [smem:[#allocation8_spill]] (!%p2324_p5) }
 0x40d   : > { %v2499_v31 = vpop.eup %2498 }
 0x40e   : > { %v1566_v32 = vsel %vm1050_vm4, %v2499_v31, 0.0 }
 0x40f   : > { %1567 = vadd.xlane.f32.xlu0 %v1566_v32  ;;  %v2315_v32 = vld [vmem:[%s2974_s26] ss:$0 sm:$0xff] }
 0x41c   : > { %1404 = vrot.lane.b32.xlu1 %v2766_v42, %s2535_s3 }
 0x420   : > { %1571 = vrot.lane.b32.xlu1 %v2766_v42, %s2536_s30 }
 0x425   : > { %1229 = vrot.lane.b32.xlu0 %v2762_v41, %s2536_s30 }
 0x48c   : > { %v1059_v34 = vpop.xlane.xlu1 %1058 }
 0x48d   : > { %2500 = vrcp.f32 %v1059_v34 }
 0x490   : > { %v1226_v35 = vpop.xlane.xlu0 %1225 }
 0x491   : > { %2502 = vrcp.f32 %v1226_v35 }
 0x494   : > { %v1401_v38 = vpop.xlane.xlu1 %1400 }
 0x495   : > { %2504 = vrcp.f32 %v1401_v38 }
 0x498   : > { %v1568_v39 = vpop.xlane.xlu0 %1567  ;;  %v1405_v42 = vpop.permute.xlu1 %1404 }
 0x499   : > { %2506 = vrcp.f32 %v1568_v39 }
 0x49a   : > { %v2501_v40 = vpop.eup %2500 }
 0x49b   : > { %v1061_v43 = vmul.f32 %v2501_v40, %v2493_v25 }
 0x49c   : > { %v1230_v44 = vpop.permute.xlu0 %1229  ;;  %v1572_v48 = vpop.permute.xlu1 %1571 }
 0x49d   : > { %2398 = vmatmul.mubr.msk.f32.vlgmr.msra.gmra.mxu1 %vm1050_vm4, %v1061_v43 }
 0x49e   : > { %v2503_v45 = vpop.eup %2502  ;;  %2406 = vmatpush3.msra.mxu1 %v1230_v44  ;;  %2407 = vmatprep.mubr.msk.f32.mxu1 %vm2531_vm2, %v2530_v37  ;;  %v1908_v44 = vld [vmem:[%s2706_s25 + $0x38] sm:$0xff] }
 0x49f   : > { %2415 = vmatprep.subr.mxu1 %v2530_v37  ;;  %v1228_v41 = vmul.f32 %v2503_v45, %v2495_v27  ;;  %2452 = vmatprep.subr.mxu0 %v1908_v44  ;;  %v1907_v45 = vld [vmem:[%s2706_s25 + $0x30] sm:$0xff] }
 0x4a1   : > { %2408 = vmatmul.mubr.msk.f32.vlgmr.msra.gmra.mxu1 %vm1050_vm4, %v1228_v41  ;;  %v1905_v41 = vld [vmem:[%s2706_s25 + $0x20] sm:$0xff] }
 0x4a2   : > { %v2505_v46 = vpop.eup %2504  ;;  %2416 = vmatpush3.msra.mxu1 %v1405_v42  ;;  %2417 = vmatprep.mubr.msk.f32.mxu1 %vm2531_vm2, %v2530_v37  ;;  %v1906_v42 = vld [vmem:[%s2706_s25 + $0x28] sm:$0xff] }
 0x4a3   : > { %2425 = vmatprep.subr.mxu1 %v2530_v37  ;;  %v1403_v47 = vmul.f32 %v2505_v46, %v2497_v29  ;;  %v1904_v46 = vld [vmem:[%s2706_s25 + $0x18] sm:$0xff] }
 0x4a5   : > { %2418 = vmatmul.mubr.msk.f32.vlgmr.msra.gmra.mxu1 %vm1050_vm4, %v1403_v47  ;;  %v1903_v47 = vld [vmem:[%s2706_s25 + $0x10] sm:$0xff] }
 0x4a6   : > { %v2507_v49 = vpop.eup %2506  ;;  %2426 = vmatpush3.msra.mxu1 %v1572_v48  ;;  %2427 = vmatprep.mubr.msk.f32.mxu1 %vm2531_vm2, %v2530_v37  ;;  %v1902_v48 = vld [vmem:[%s2706_s25 + $0x8] sm:$0xff] }
 0x4a7   : > { %v1570_v50 = vmul.f32 %v2507_v49, %v2499_v31  ;;  %2441 = vmatprep.subr.mxu1 %v1794_v19  ;;  %v1901_v49 = vld [vmem:[%s2706_s25] sm:$0xff]  ;;  %s2978_s25 = sld [smem:[#allocation12_spill]] (!%p2324_p5) }
 0x4a9   : > { %2428 = vmatmul.mubr.msk.f32.vlgmr.msra.gmra.mxu1 %vm1050_vm4, %v1570_v50  ;;  %v2316_v50 = vld [vmem:[%s801_s11] ss:$0 sm:$0xff] }
 0x4aa   : > { %2442 = vmatpush3.msra.mxu1 %v1794_v19 }
 0x4ab   : > { %2443 = vmatprep.subr.mxu1 %v1793_v20 }
 0x4ac   : > { %2444 = vmatpush3.msra.mxu1 %v1793_v20 }
 0x4ad   : > { %2445 = vmatprep.subr.mxu1 %v1792_v21 }
 0x4ae   : > { %2446 = vmatpush3.msra.mxu1 %v1792_v21 }
 0x4af   : > { %2447 = vmatprep.subr.mxu1 %v1791_v22 }
 0x4b0   : > { %2448 = vmatpush3.msra.mxu1 %v1791_v22 }
 0x55d   : > { %v1134_v55 = vpop.f32.mrf.mxu1 }
 0x55f   : > { %v2399_v56 = vpop.f32.mrf.mxu1 }
 0x561   : > { %v1301_v57 = vpop.f32.mrf.mxu1 }
 0x562   : > { %1306 = vrot.lane.b32.xlu0 %v1301_v57, %s2537_s5 }
 0x563   : > { %v2409_v37 = vpop.f32.mrf.mxu1 }
 0x565   : > { %v1476_v58 = vpop.f32.mrf.mxu1 }
 0x567   : > { %v2419_v59 = vpop.f32.mrf.mxu1 }
 0x569   : > { %v1643_v60 = vpop.f32.mrf.mxu1 }
 0x56a   : > { %1648 = vrot.lane.b32.xlu1 %v1643_v60, %s2537_s5  ;;  %s2979_s5 = sld [smem:[#allocation15_spill]] (!%p2324_p5) }
 0x56b   : > { %v2429_v61 = vpop.f32.mrf.mxu1 }
 0x5d4   : > { %v1307_v62 = vpop.permute.xlu0 %1306 }
 0x5d5   : > { %v1309_v63 = vsel %vm969_vm3, %v1134_v55, %v1307_v62 }
 0x5d6   : > { %2438 = vmatprep.mubr.msk.f32.mxu0 %vm883_vm1, %v1309_v63 }
 0x5dc   : > { %v1649_v0 = vpop.permute.xlu1 %1648 }
 0x5dd   : > { %v1651_v1 = vsel %vm969_vm3, %v1476_v58, %v1649_v0 }
 0x5de   : > { %2439 = vmatmul.mubr.msk.f32.vlgmr.msra.gmra.mxu0 %vm883_vm1, %v1651_v1 }
 0x5df   : > { %2453 = vmatpush3.msra.mxu0 %v1908_v44 }
 0x5e0   : > { %2454 = vmatprep.subr.mxu0 %v1907_v45 }
 0x5e1   : > { %2455 = vmatpush3.msra.mxu0 %v1907_v45 }
 0x5e2   : > { %2456 = vmatprep.subr.mxu0 %v1906_v42 }
 0x5e3   : > { %2457 = vmatpush3.msra.mxu0 %v1906_v42 }
 0x5e4   : > { %2458 = vmatprep.subr.mxu0 %v1905_v41 }
 0x5e5   : > { %2459 = vmatpush3.msra.mxu0 %v1905_v41 }
 0x5e6   : > { %2460 = vmatprep.subr.mxu0 %v1904_v46 }
 0x5e7   : > { %2461 = vmatpush3.msra.mxu0 %v1904_v46 }
 0x5e8   : > { %2462 = vmatprep.subr.mxu0 %v1903_v47 }
 0x5e9   : > { %2463 = vmatpush3.msra.mxu0 %v1903_v47 }
 0x5ea   : > { %2464 = vmatprep.subr.mxu0 %v1902_v48 }
 0x5eb   : > { %2465 = vmatpush3.msra.mxu0 %v1902_v48 }
 0x5ec   : > { %2466 = vmatprep.subr.mxu0 %v1901_v49 }
 0x5ed   : > { %2467 = vmatpush3.msra.mxu0 %v1901_v49 }
 0x69e   : > { %v2440_v3 = vpop.f32.mrf.mxu0 }
 0x69f   : > { %v1741_v4 = vadd.f32 %v2440_v3, %v2311_v2 }
 0x6a0   : > { %v1735_v5 = vpop.f32.mrf.mxu0 }
 0x6a1   : > { %v1736_v6 = vadd.f32 %v2311_v2, %v1735_v5  ;;  %v1745_v7 = vadd.f32 %v1741_v4, %v2747_v36 }
 0x6a3   : > { %v1751_v8 = vsel %vm883_vm1, %v1745_v7, 0.0  ;;  %v1744_v9 = vadd.f32 %v1736_v6, %v2741_v33 }
 0x6a4   : > { %1752 = vadd.xlane.f32.xlu1 %v1751_v8  ;;  %v2319_v8 = vld [vmem:[%s809_s28] ss:$0 sm:$0xff] }
 0x6a5   : > { %v1748_v10 = vsel %vm883_vm1, %v1744_v9, 0.0 }
 0x6a6   : > { %1749 = vadd.xlane.f32.xlu0 %v1748_v10 }
 0x72d   : > { %v1753_v11 = vpop.xlane.xlu1 %1752 }
 0x72e   : > { %v1756_v12 = vmul.f32 0.03125, %v1753_v11 }
 0x72f   : > { %v1750_v13 = vpop.xlane.xlu0 %1749 }
 0x730   : > { %v1755_v14 = vmul.f32 0.03125, %v1750_v13  ;;  %v1758_v15 = vsub.f32 %v1745_v7, %v1756_v12 }
 0x732   : > { %v1757_v16 = vsub.f32 %v1744_v9, %v1755_v14  ;;  %v1760_v18 = vmul.f32 %v1758_v15, %v1758_v15 }
 0x734   : > { %v1759_v17 = vmul.f32 %v1757_v16, %v1757_v16  ;;  %v1764_v33 = vsel %vm883_vm1, %v1760_v18, 0.0 }
 0x736   : > { %v1761_v36 = vsel %vm883_vm1, %v1759_v17, 0.0 }
 0x737   : > { %1762 = vadd.xlane.f32.xlu0 %v1761_v36 }
 0x73b   : > { %1765 = vadd.xlane.f32.xlu0 %v1764_v33 }
 0x7c0   : > { %v1763_v23 = vpop.xlane.xlu0 %1762 }
 0x7c1   : > { %v1767_v24 = vmul.f32 0.03125, %v1763_v23 }
 0x7c3   : > { %v1769_v25 = vadd.f32 1e-12, %v1767_v24 }
 0x7c4   : > { %v1766_v26 = vpop.xlane.xlu0 %1765 }
 0x7c5   : > { %2508 = vrsqrt.f32 %v1769_v25  ;;  %v1768_v27 = vmul.f32 0.03125, %v1766_v26 }
 0x7c7   : > { %v1770_v28 = vadd.f32 1e-12, %v1768_v27 }
 0x7c9   : > { %2510 = vrsqrt.f32 %v1770_v28 }
 0x7d2   : > { %v2509_v29 = vpop.eup %2508 }
 0x7d3   : > { %v1773_v31 = vmul.f32 %v2509_v29, %v1757_v16 }
 0x7d5   : > { %v1781_v34 = vmul.f32 %v2314_v30, %v1773_v31 }
 0x7d6   : > { %v2511_v35 = vpop.eup %2510 }
 0x7d7   : > { %v1774_v38 = vmul.f32 %v2511_v35, %v1758_v15  ;;  %v2854_v39 = vadd.f32 %v2315_v32, %v1781_v34 }
 0x7d9   : > { %v1782_v40 = vmul.f32 %v2314_v30, %v1774_v38  ;;  %2449 = vmatprep.mubr.msk.f32.mxu1 %vm883_vm1, %v2854_v39  ;;  %v2323_v38 = vld [vmem:[%s815_s7] ss:$0 sm:$0xff] }
 0x7db   : > { %v1790_v43 = vadd.f32 %v2315_v32, %v1782_v40  ;;  %v2322_v32 = vld [vmem:[%s812_s4] ss:$0 sm:$0xff] }
 0x7dd   : > { %2450 = vmatmul.mubr.msk.f32.vlgmr.msra.gmra.mxu1 %vm883_vm1, %v1790_v43 }
 0x89d   : > { %v2451_v51 = vpop.f32.mrf.mxu1 }
 0x89e   : > { %v1880_v52 = vadd.f32 %v2451_v51, %v2316_v50 }
 0x89f   : > { %v1874_v53 = vpop.f32.mrf.mxu1 }
 0x8a0   : > { %v1884_v54 = vmul.f32 %v1880_v52, %v1880_v52  ;;  %v1875_v55 = vadd.f32 %v2316_v50, %v1874_v53 }
 0x8a2   : > { %v1886_v56 = vmul.f32 %v1884_v54, %v1880_v52  ;;  %v1883_v57 = vmul.f32 %v1875_v55, %v1875_v55 }
 0x8a4   : > { %v1888_v37 = vmul.f32 0.044715, %v1886_v56  ;;  %v1885_v58 = vmul.f32 %v1883_v57, %v1875_v55 }
 0x8a6   : > { %v1890_v59 = vadd.f32 %v1888_v37, %v1880_v52  ;;  %v1887_v60 = vmul.f32 0.044715, %v1885_v58 }
 0x8a8   : > { %v1892_v61 = vmul.f32 0.7978846, %v1890_v59  ;;  %v1889_v62 = vadd.f32 %v1887_v60, %v1875_v55 }
 0x8aa   : > { %2512 = vtanh.f32 %v1892_v61  ;;  %v1891_v63 = vmul.f32 0.7978846, %v1889_v62 }
 0x8ac   : > { %2514 = vtanh.f32 %v1891_v63 }
 0x8b7   : > { %v2513_v0 = vpop.eup %2512 }
 0x8b8   : > { %v1896_v1 = vadd.f32 1.0, %v2513_v0 }
 0x8b9   : > { %v2515_v2 = vpop.eup %2514 }
 0x8ba   : > { %v1895_v3 = vadd.f32 1.0, %v2515_v2  ;;  %v1898_v4 = vmul.f32 0.5, %v1896_v1 }
 0x8bc   : > { %v1897_v5 = vmul.f32 0.5, %v1895_v3  ;;  %v1900_v7 = vmul.f32 %v1898_v4, %v1880_v52 }
 0x8be   : > { %v1899_v6 = vmul.f32 %v1897_v5, %v1875_v55 }
 0x8c0   : > { %2468 = vmatprep.mubr.msk.f32.mxu0 %vm1916_vm5, %v1899_v6 }
 0x8c1   : > { %2469 = vmatmul.mubr.msk.f32.vlgmr.msra.gmra.mxu0 %vm1916_vm5, %v1900_v7 }
 0x981   : > { %v2470_v9 = vpop.f32.mrf.mxu0 }
 0x982   : > { %v1995_v10 = vadd.f32 %v2470_v9, %v2319_v8 }
 0x983   : > { %v1989_v11 = vpop.f32.mrf.mxu0 }
 0x984   : > { %v1990_v12 = vadd.f32 %v2319_v8, %v1989_v11  ;;  %v1999_v13 = vadd.f32 %v1995_v10, %v1790_v43 }
 0x986   : > { %v2005_v14 = vsel %vm883_vm1, %v1999_v13, 0.0  ;;  %v1998_v15 = vadd.f32 %v1990_v12, %v2854_v39 }
 0x987   : > { %2006 = vadd.xlane.f32.xlu0 %v2005_v14 }
 0x988   : > { %v2002_v16 = vsel %vm883_vm1, %v1998_v15, 0.0 }
 0x989   : > { %2003 = vadd.xlane.f32.xlu1 %v2002_v16 }
 0xa10   : > { %v2007_v17 = vpop.xlane.xlu0 %2006 }
 0xa11   : > { %v2009_v36 = vmul.f32 0.03125, %v2007_v17 }
 0xa12   : > { %v2004_v18 = vpop.xlane.xlu1 %2003 }
 0xa13   : > { %v2011_v33 = vsub.f32 %v1999_v13, %v2009_v36  ;;  %v2008_v19 = vmul.f32 0.03125, %v2004_v18 }
 0xa15   : > { %v2010_v20 = vsub.f32 %v1998_v15, %v2008_v19  ;;  %v2013_v21 = vmul.f32 %v2011_v33, %v2011_v33 }
 0xa17   : > { %v2017_v22 = vsel %vm883_vm1, %v2013_v21, 0.0  ;;  %v2012_v23 = vmul.f32 %v2010_v20, %v2010_v20 }
 0xa18   : > { %2018 = vadd.xlane.f32.xlu0 %v2017_v22 }
 0xa19   : > { %v2014_v24 = vsel %vm883_vm1, %v2012_v23, 0.0 }
 0xa1a   : > { %2015 = vadd.xlane.f32.xlu1 %v2014_v24 }
 0xaa1   : > { %v2019_v25 = vpop.xlane.xlu0 %2018 }
 0xaa2   : > { %v2021_v26 = vmul.f32 0.03125, %v2019_v25 }
 0xaa3   : > { %v2016_v27 = vpop.xlane.xlu1 %2015 }
 0xaa4   : > { %v2023_v28 = vadd.f32 1e-12, %v2021_v26  ;;  %v2020_v29 = vmul.f32 0.03125, %v2016_v27 }
 0xaa6   : > { %2516 = vrsqrt.f32 %v2023_v28  ;;  %v2022_v30 = vadd.f32 1e-12, %v2020_v29 }
 0xaa8   : > { %2518 = vrsqrt.f32 %v2022_v30 }
 0xab3   : > { %v2517_v31 = vpop.eup %2516 }
 0xab4   : > { %v2027_v34 = vmul.f32 %v2517_v31, %v2011_v33 }
 0xab5   : > { %v2519_v35 = vpop.eup %2518 }
 0xab6   : > { %v2035_v39 = vmul.f32 %v2322_v32, %v2027_v34  ;;  %v2026_v40 = vmul.f32 %v2519_v35, %v2010_v20 }
 0xab8   : > { %v2043_v43 = vadd.f32 %v2323_v38, %v2035_v39  ;;  %v2034_v44 = vmul.f32 %v2322_v32, %v2026_v40  ;;  %2049 = sbr.rel (%p2324_p5) target bundleno = 3049 (0xbe9), region = 112 }
 0xaba   : > { %2045 = vst.msk [vmem:[#allocation2 + $0x8] sm:$0xff] %vm883_vm1, %v2043_v43  ;;  %v2042_v45 = vadd.f32 %v2323_v38, %v2034_v44 }
 0xabc   : > { %2044 = vst.msk [vmem:[#allocation2] sm:$0xff] %vm883_vm1, %v2042_v45 }
 0xabd   : > { %v2051_v42 = vld [vmem:[%s2975_s23 + $0x8] sm:$0xff]  ;;  %v2050_v41 = vld [vmem:[%s2975_s23] sm:$0xff]  ;;  %v2538_v46 = vmov 0   ;;  %vm2088_vm6 = vcmask 253952   ;;  %vm2141_vm7 = vcmask 1040384   ;;  %vm2143_vm8 = vcmask 1024  }
 0xabe   : > { %2521 = vset.pattern.permute.xlu1 %v2538_v46  ;;  %2520 = vset.pattern.permute.xlu0 %v2538_v46  ;;  %v2053_v47 = vld [vmem:[%s2976_s0 + $0x8] sm:$0xff]  ;;  %v2052_v48 = vld [vmem:[%s2976_s0] sm:$0xff] }
 0xabf   : > { %2100 = vperm.xlu0 %2520, %v2051_v42   ;;  %2059 = vperm.xlu1 %2521, %v2050_v41   ;;  %v2054_v33 = vld [vmem:[%s2977_s29] sm:$0x1] }
 0xac0   : > { %v2055_v26 = vld [vmem:[%s2978_s25] sm:$0x1] }
 0xac3   : > { %2115 = vperm.xlu0 %2520, %v2053_v47   ;;  %2074 = vperm.xlu1 %2521, %v2052_v48  }
 0xb3a   : > { %v2101_v49 = vpop.permute.xlu0 %2100  ;;  %v2060_v50 = vpop.permute.xlu1 %2059 }
 0xb3b   : > { %v2103_v51 = vmul.f32 %v2101_v49, %v2043_v43  ;;  %v2062_v52 = vmul.f32 %v2060_v50, %v2042_v45 }
 0xb3d   : > { %v2104_v53 = vadd.f32 1.0, %v2103_v51  ;;  %v2063_v54 = vadd.f32 1.0, %v2062_v52 }
 0xb3e   : > { %v2116_v55 = vpop.permute.xlu0 %2115  ;;  %v2075_v56 = vpop.permute.xlu1 %2074 }
 0xb3f   : > { %v2105_v57 = vsel %vm883_vm1, %v2104_v53, -inf  ;;  %v2064_v37 = vsel %vm883_vm1, %v2063_v54, -inf  ;;  %v2118_v58 = vmul.f32 %v2116_v55, %v2043_v43  ;;  %v2077_v59 = vmul.f32 %v2075_v56, %v2042_v45  ;;  %v2056_v43 = vld [vmem:[#allocation3] sm:$0x1] }
 0xb40   : > { %v2106_v60 = vrot.slane %v2105_v57, 4  ;;  %v2065_v61 = vrot.slane %v2064_v37, 4 }
 0xb41   : > { %v2119_v62 = vadd.f32 1.0, %v2118_v58  ;;  %v2078_v63 = vadd.f32 1.0, %v2077_v59 }
 0xb42   : > { %v2107_v0 = vmax.f32 %v2105_v57, %v2106_v60  ;;  %v2066_v1 = vmax.f32 %v2064_v37, %v2065_v61 }
 0xb43   : > { %v2120_v2 = vsel %vm883_vm1, %v2119_v62, -inf  ;;  %v2079_v3 = vsel %vm883_vm1, %v2078_v63, -inf }
 0xb44   : > { %v2108_v4 = vrot.slane %v2107_v0, 2  ;;  %v2067_v5 = vrot.slane %v2066_v1, 2  ;;  %v2121_v6 = vrot.slane %v2120_v2, 4  ;;  %v2080_v7 = vrot.slane %v2079_v3, 4 }
 0xb46   : > { %v2109_v8 = vmax.f32 %v2107_v0, %v2108_v4  ;;  %v2068_v9 = vmax.f32 %v2066_v1, %v2067_v5  ;;  %v2122_v10 = vmax.f32 %v2120_v2, %v2121_v6  ;;  %v2081_v11 = vmax.f32 %v2079_v3, %v2080_v7 }
 0xb48   : > { %v2110_v12 = vrot.slane %v2109_v8, 1  ;;  %v2069_v13 = vrot.slane %v2068_v9, 1  ;;  %v2123_v14 = vrot.slane %v2122_v10, 2  ;;  %v2082_v15 = vrot.slane %v2081_v11, 2 }
 0xb4a   : > { %v2124_v16 = vmax.f32 %v2122_v10, %v2123_v14  ;;  %v2083_v17 = vmax.f32 %v2081_v11, %v2082_v15  ;;  %v2111_v36 = vmax.f32 %v2109_v8, %v2110_v12  ;;  %v2070_v18 = vmax.f32 %v2068_v9, %v2069_v13 }
 0xb4c   : > { %v2125_v19 = vrot.slane %v2124_v16, 1  ;;  %v2084_v20 = vrot.slane %v2083_v17, 1  ;;  %v2327_v21 = vadd.f32 -1.0, %v2111_v36  ;;  %v2325_v22 = vadd.f32 -1.0, %v2070_v18 }
 0xb4e   : > { %v2128_v23 = vmul.f32 %v2327_v21, %v2054_v33  ;;  %v2126_v24 = vmax.f32 %v2124_v16, %v2125_v19  ;;  %v2085_v25 = vmax.f32 %v2083_v17, %v2084_v20  ;;  %v2087_v29 = vmul.f32 %v2325_v22, %v2054_v33 }
 0xb50   : > { %v2129_v27 = vsel %vm2088_vm6, %v2128_v23, 0.0  ;;  %v2328_v28 = vadd.f32 -1.0, %v2126_v24  ;;  %v2326_v30 = vadd.f32 -1.0, %v2085_v25  ;;  %v2089_v34 = vsel %vm2088_vm6, %v2087_v29, 0.0 }
 0xb51   : > { %2130 = vadd.xlane.f32.xlu0 %v2129_v27 }
 0xb52   : > { %v2132_v31 = vmul.f32 %v2328_v28, %v2055_v26  ;;  %v2092_v35 = vmul.f32 %v2326_v30, %v2055_v26 }
 0xb54   : > { %v2133_v32 = vsel %vm2088_vm6, %v2132_v31, 0.0  ;;  %v2093_v38 = vsel %vm2088_vm6, %v2092_v35, 0.0 }
 0xb55   : > { %2134 = vadd.xlane.f32.xlu1 %v2133_v32  ;;  %2090 = vadd.xlane.f32.xlu0 %v2089_v34 }
 0xb59   : > { %2094 = vadd.xlane.f32.xlu0 %v2093_v38 }
 0xbda   : > { %v2131_v39 = vpop.xlane.xlu0 %2130 }
 0xbde   : > { %v2091_v40 = vpop.xlane.xlu0 %2090  ;;  %v2135_v44 = vpop.xlane.xlu1 %2134 }
 0xbdf   : > { %v2136_v45 = vadd.f32 %v2135_v44, %v2131_v39 }
 0xbe1   : > { %v2137_v42 = vadd.f32 %v2136_v45, %v2056_v43 }
 0xbe2   : > { %v2095_v41 = vpop.xlane.xlu0 %2094 }
 0xbe3   : > { %v2096_v46 = vadd.f32 %v2095_v41, %v2091_v40  ;;  %v2139_v47 = vrot.slane %v2137_v42, 7 }
 0xbe5   : > { %v2097_v48 = vadd.f32 %v2096_v46, %v2056_v43 }
 0xbe7   : > { %v2142_v49 = vsel %vm2141_vm7, %v2097_v48, %v2139_v47 }
 0xbe8   : > { %2144 = vst.msk [vmem:[%s2979_s5] sm:$0x3] %vm2143_vm8, %v2142_v49 }
 0xbe9 PF: > { %s2980_s1 = sld [smem:[#allocation4_spill]] }
 0xbef   : > { %s33_s26 = sadd.s32 1, %s2980_s1  }
 0xbf0   : > { %p30_p6 = scmp.ge.s32.totalorder %s33_s26, 4  }
 0xbf2   :  { %32 = sbr.rel (!%p30_p6) target bundleno = 12 (0xc), region = 171 }

</bundles_post_ra>
